<compile_context>
chip_gen: v5e
topology: v5e:2x2
jax: 0.10.0
libtpu: 0.0.40
codegen_flags: <defaults>
</compile_context>

<pallas_src>
import functools
import numpy as np
import jax
import jax.numpy as jnp
from jax.experimental import pallas as pl
from jax.experimental.pallas import tpu as pltpu


# ---------------------------------------------------------------------------
# Static operator matrices (built once, on host)
# ---------------------------------------------------------------------------
def adaptive_pool_matrix(in_size, out_size):
    """1-D AdaptiveAvgPool weights as an [in, out] matrix (PyTorch start/end rule)."""
    m = np.zeros((in_size, out_size), np.float32)
    for i in range(out_size):
        s = (i * in_size) // out_size
        e = -((-(i + 1) * in_size) // out_size)
        m[s:e, i] = 1.0 / (e - s)
    return m


def bilinear_matrix(in_size, out_size):
    """1-D bilinear (align_corners=True) resize weights as an [in, out] matrix."""
    m = np.zeros((in_size, out_size), np.float32)
    for i in range(out_size):
        pos = 0.0 if out_size == 1 else i * (in_size - 1) / (out_size - 1)
        lo = min(int(np.floor(pos)), in_size - 1)
        hi = min(lo + 1, in_size - 1)
        frac = pos - lo
        m[lo, i] += 1.0 - frac
        m[hi, i] += frac
    return m


def _round_up(v, m):
    return ((v + m - 1) // m) * m


# ---------------------------------------------------------------------------
# Fused PPM kernel.
#   grid = (batch, n_s + n_out)
#     steps 0 .. n_s-1 : pooling reduction over spatial chunks of size `thw`
#     steps n_s .. end : epilogue, one (NRp, hw_tile) output tile per step
#
#   x_ref    : [Cp, thw]      channels-first activation chunk (bf16)
#   pool_ref : [thw, BBp]     chunk of the Kronecker adaptive-pool matrix (bf16)
#   wT_ref   : [NRp, Cp]      BN-folded 1x1-conv weights, all bins concatenated (bf16)
#   bm_ref   : [NRp, BBp]     bias on block diagonal, -1e30 off-diagonal (f32)
#   upT_ref  : [BBp, hw_tile] Kronecker bilinear-upsample tile (bf16)
#   o_ref    : [NRp, hw_tile] channels-first PPM output tile (f32)
#   acc_ref  : [Cp, BBp]      pooled-feature accumulator (f32 scratch)
#   zT_ref   : [NRp, BBp]     conv+BN+ReLU result, reused across output tiles (bf16)
# ---------------------------------------------------------------------------
def _ppm_kernel(x_ref, pool_ref, wT_ref, bm_ref, upT_ref, o_ref, acc_ref, zT_ref, *, n_s):
    s = pl.program_id(1)

    @pl.when(s == 0)
    def _():
        acc_ref[...] = jnp.zeros_like(acc_ref)

    # Phase 1: adaptive average pooling of ALL bins, accumulated over spatial chunks.
    @pl.when(s < n_s)
    def _():
        acc_ref[...] += jnp.dot(x_ref[...], pool_ref[...],
                                preferred_element_type=jnp.float32)

    # Phase 2a (once per image): 1x1 conv with BN folded in, bias + cross-bin mask
    # (both folded into bm_ref: ReLU clamps the -1e30 off-diagonal blocks to 0).
    @pl.when(s == n_s)
    def _():
        z = jnp.dot(wT_ref[...], acc_ref[...].astype(wT_ref.dtype),
                    preferred_element_type=jnp.float32)
        zT_ref[...] = jnp.maximum(z + bm_ref[...], 0.0).astype(zT_ref.dtype)

    # Phase 2b: bilinear (align_corners=True) upsample, one HW tile per grid step.
    @pl.when(s >= n_s)
    def _():
        o_ref[...] = jnp.dot(zT_ref[...], upT_ref[...],
                             preferred_element_type=jnp.float32).astype(o_ref.dtype)


# ---------------------------------------------------------------------------
# Parameters (PyTorch-equivalent) and one-time operand folding / tile selection
# ---------------------------------------------------------------------------
def init_params(key, in_dim, reduction_dim, bins):
    """Conv2d(in_dim, reduction_dim, 1, bias=False) + BatchNorm2d defaults (eval)."""
    params = dict(conv_w=[], bn_gamma=[], bn_beta=[], bn_mean=[], bn_var=[])
    for _ in bins:
        key, k1 = jax.random.split(key)
        w = jax.random.normal(k1, (reduction_dim, in_dim), jnp.float32) / np.sqrt(in_dim)
        params['conv_w'].append(w)
        params['bn_gamma'].append(jnp.ones((reduction_dim,), jnp.float32))
        params['bn_beta'].append(jnp.zeros((reduction_dim,), jnp.float32))
        params['bn_mean'].append(jnp.zeros((reduction_dim,), jnp.float32))
        params['bn_var'].append(jnp.ones((reduction_dim,), jnp.float32))
    return params


def build_ppm_operands(params, in_dim, reduction_dim, bins, H, W, eps=1e-5):
    """Pre-fold BN into the conv weights, pre-build/pad every static operand and pick
    the VMEM-budget-driven tile sizes for the current TPU generation (host-side)."""
    HW = H * W
    C = in_dim
    Cp = _round_up(C, 8)                  # sublane-aligned channel count
    R = reduction_dim
    NR = len(bins) * R
    NRp = _round_up(NR, 128)              # lane-dense output rows / weight rows
    BB = sum(b * b for b in bins)
    BBp = _round_up(BB, 8)                # sublane-aligned pooled-cell count

    # --- per-generation VMEM capacity (review: no hard 64 MiB clamp) ---
    try:
        vmem_cap = int(pltpu.get_tpu_info().vmem_capacity_bytes)
    except Exception:
        vmem_cap = 64 * 2 ** 20           # conservative per-core fallback (v7x)

    BF, F4 = 2, 4                         # bf16 / f32 byte widths
    hw128 = _round_up(HW, 128)

    # Output / upsample tiling (epilogue phase).
    hw_tile = min(512, hw128)
    HWo = _round_up(HW, hw_tile)
    n_out = HWo // hw_tile

    # Streamed spatial tile: largest multiple of 128 fitting ~70% of VMEM after the
    # resident operands (weights, bias/mask, up tile, output tile, scratches).
    resident = (2 * NRp * Cp * BF         # folded conv weight (worst case 2 buffers)
                + 2 * NRp * BBp * F4      # bias/mask
                + 2 * BBp * hw_tile * BF  # upsample tile, double-buffered
                + 2 * NRp * hw_tile * F4  # output tile, double-buffered
                + Cp * BBp * F4           # acc scratch
                + NRp * BBp * BF)         # zT scratch
    per_thw = 2 * (Cp + BBp) * BF         # double-buffered x + pool chunks, per column
    budget = int(0.70 * vmem_cap)
    avail = max(budget - resident, 128 * per_thw)
    thw = max(128, min(2048, hw128, (avail // per_thw) // 128 * 128))
    HWp = _round_up(HW, thw)              # spatial pad so thw always divides evenly
    n_s = HWp // thw

    # --- static matrices (spatial pad regions are zero; never affect results) ---
    pool = np.zeros((HWp, BBp), np.float32)       # [spatial, pooled cells]
    upT = np.zeros((BBp, HWo), np.float32)        # [pooled cells, spatial]
    wT = np.zeros((NRp, Cp), np.float32)          # [out channels, in channels]
    bias_mask = np.full((NRp, BBp), -1e30, np.float32)

    row = 0
    for k, b in enumerate(bins):
        bb = b * b
        Ph = adaptive_pool_matrix(H, b)                   # [H, b]
        Pw = adaptive_pool_matrix(W, b)                   # [W, b]
        pool[:HW, row:row + bb] = np.kron(Ph, Pw)         # [HW, b*b]
        Bh = bilinear_matrix(b, H)                        # [b, H]
        Bw = bilinear_matrix(b, W)                        # [b, W]
        upT[row:row + bb, :HW] = np.kron(Bh, Bw)          # [b*b, HW]

        conv_w = np.asarray(params['conv_w'][k])          # [R, C]
        gamma = np.asarray(params['bn_gamma'][k])
        beta = np.asarray(params['bn_beta'][k])
        mean = np.asarray(params['bn_mean'][k])
        var = np.asarray(params['bn_var'][k])
        scale = gamma / np.sqrt(var + eps)
        wT[k * R:(k + 1) * R, :C] = conv_w * scale[:, None]
        bias_mask[k * R:(k + 1) * R, row:row + bb] = (beta - mean * scale)[:, None]
        row += bb

    return dict(
        pool=jnp.asarray(pool, jnp.bfloat16),
        upT=jnp.asarray(upT, jnp.bfloat16),
        wT=jnp.asarray(wT, jnp.bfloat16),
        bias_mask=jnp.asarray(bias_mask, jnp.float32),
        C=C, Cp=Cp, NR=NR, NRp=NRp, BBp=BBp,
        HW=HW, HWp=HWp, HWo=HWo, thw=thw, hw_tile=hw_tile,
        n_s=n_s, n_out=n_out, vmem_cap=vmem_cap)


# ---------------------------------------------------------------------------
# PPM forward (NCHW in / NCHW out; channels-first inside — no boundary transposes)
# ---------------------------------------------------------------------------
def ppm_forward(x_nchw, ops, *, invariant_buffers=1):
    N, C, H, W = x_nchw.shape
    HW = H * W
    Cp, NR, NRp, BBp = ops['Cp'], ops['NR'], ops['NRp'], ops['BBp']
    HWp, HWo, thw, hw_tile = ops['HWp'], ops['HWo'], ops['thw'], ops['hw_tile']
    n_s, n_out = ops['n_s'], ops['n_out']

    # NCHW -> [N, C, H*W] is a free reshape (no data movement).
    # TODO(synk): in a full network the producer would emit bf16 channels-first
    # directly; here the cast is a one-off boundary op.
    x_cf = x_nchw.reshape(N, C, HW).astype(jnp.bfloat16)
    if Cp != C or HWp != HW:
        x_cf = jnp.pad(x_cf, ((0, 0), (0, Cp - C), (0, HWp - HW)))

    def inv_spec(shape):
        # Grid-invariant operands: DMA'd once; single-buffer them to halve their VMEM.
        if invariant_buffers == 1:
            return pl.BlockSpec(shape, lambda n, s: (0, 0),
                                pipeline_mode=pl.Buffered(1))
        return pl.BlockSpec(shape, lambda n, s: (0, 0))

    grid_spec = pltpu.PrefetchScalarGridSpec(
        num_scalar_prefetch=0,
        grid=(N, n_s + n_out),
        in_specs=[
            # x / pool chunks: stream during the reduction phase, stay resident
            # (clamped index) during the epilogue phase.
            pl.BlockSpec((None, Cp, thw),
                         lambda n, s: (n, 0, jnp.minimum(s, n_s - 1))),
            pl.BlockSpec((thw, BBp),
                         lambda n, s: (jnp.minimum(s, n_s - 1), 0)),
            inv_spec((NRp, Cp)),                       # folded conv weight
            inv_spec((NRp, BBp)),                      # folded bias + block mask
            pl.BlockSpec((BBp, hw_tile),
                         lambda n, s: (0, jnp.maximum(s - n_s, 0))),   # upsample tile
        ],
        out_specs=pl.BlockSpec((None, NRp, hw_tile),
                               lambda n, s: (n, 0, jnp.maximum(s - n_s, 0))),
        scratch_shapes=[pltpu.VMEM((Cp, BBp), jnp.float32),
                        pltpu.VMEM((NRp, BBp), jnp.bfloat16)],
    )

    flops = 2 * N * (HWp * Cp * BBp + NRp * Cp * BBp + HWo * BBp * NRp)
    bytes_accessed = (N * Cp * HWp * 2 + HWp * BBp * 2 + NRp * Cp * 2
                      + NRp * BBp * 4 + BBp * HWo * 2 + N * NRp * HWo * 4)
    vmem_limit = int(max(16 * 2 ** 20,
                         min(int(0.85 * ops['vmem_cap']), 110 * 2 ** 20)))

    out_cf = pl.pallas_call(
        functools.partial(_ppm_kernel, n_s=n_s),
        out_shape=jax.ShapeDtypeStruct((N, NRp, HWo), jnp.float32),
        grid_spec=grid_spec,
        compiler_params=pltpu.CompilerParams(
            dimension_semantics=("parallel", "arbitrary"),
            vmem_limit_bytes=vmem_limit),
        cost_estimate=pl.CostEstimate(flops=flops, transcendentals=0,
                                      bytes_accessed=bytes_accessed),
    )(x_cf, ops['pool'], ops['wT'], ops['bias_mask'], ops['upT'])

    # Already channels-first: just drop padding and reshape (no transpose).
    ppm_nchw = out_cf[:, :NR, :HW].reshape(N, NR, H, W)
    # torch.cat([x] + branch_outputs, dim=1)
    return jnp.concatenate([x_nchw, ppm_nchw], axis=1)


# ---------------------------------------------------------------------------
# Pure-JAX reference (independent compute path, f32 HIGHEST precision)
# ---------------------------------------------------------------------------
def ppm_reference(x_nchw, params, bins, eps=1e-5):
    N, C, H, W = x_nchw.shape
    hp = jax.lax.Precision.HIGHEST
    outs = [x_nchw]
    for k, b in enumerate(bins):
        Ph = jnp.asarray(adaptive_pool_matrix(H, b))
        Pw = jnp.asarray(adaptive_pool_matrix(W, b))
        pooled = jnp.einsum('nchw,hi,wj->ncij', x_nchw, Ph, Pw, precision=hp)
        y = jnp.einsum('ncij,rc->nrij', pooled, params['conv_w'][k], precision=hp)
        scale = params['bn_gamma'][k] / jnp.sqrt(params['bn_var'][k] + eps)
        shift = params['bn_beta'][k] - params['bn_mean'][k] * scale
        y = jnp.maximum(y * scale[None, :, None, None] + shift[None, :, None, None], 0.0)
        Bh = jnp.asarray(bilinear_matrix(b, H))
        Bw = jnp.asarray(bilinear_matrix(b, W))
        outs.append(jnp.einsum('nrij,ih,jw->nrhw', y, Bh, Bw, precision=hp))
    return jnp.concatenate(outs, axis=1)


if __name__ == "__main__":
    BINS = (1, 2, 3, 6)
    IN_DIM, RED_DIM = 64, 16
    N, H, W = 2, 16, 16

    key = jax.random.PRNGKey(0)
    key, kx = jax.random.split(key)
    x = jax.random.normal(kx, (N, IN_DIM, H, W), jnp.float32)

    params = init_params(key, IN_DIM, RED_DIM, BINS)
    ops = build_ppm_operands(params, IN_DIM, RED_DIM, BINS, H, W)

    # Prefer single-buffered invariant operands (Buffered(1)); if this JAX build does
    # not support that pipeline_mode, fall back to default double buffering.
    out = None
    for buffers in (1, 2):
        try:
            fwd = jax.jit(functools.partial(ppm_forward, ops=ops,
                                            invariant_buffers=buffers))
            out = jax.block_until_ready(fwd(x))
            break
        except Exception:
            if buffers == 2:
                raise

    assert out.shape == (N, IN_DIM + len(BINS) * RED_DIM, H, W), out.shape
    assert out.dtype == jnp.float32
    assert bool(jnp.all(jnp.isfinite(out)))

    ref = jax.block_until_ready(ppm_reference(x, params, BINS))
    err = float(jnp.max(jnp.abs(out - ref)))
    # bf16 operands with f32 accumulation — loosened tolerance vs. the f32 reference.
    assert err < 3e-2, f"max abs err {err}"

    print("KERNEL_OK")
</pallas_src>

<mosaic_0001>
module attributes {stable_mosaic.version = 11 : i64} {
  func.func @_ppm_kernel(%arg0: i32, %arg1: i32, %arg2: memref<1x64x256xbf16, #tpu.memory_space<vmem>>, %arg3: memref<256x56xbf16, #tpu.memory_space<vmem>>, %arg4: memref<128x64xbf16, #tpu.memory_space<vmem>>, %arg5: memref<128x56xf32, #tpu.memory_space<vmem>>, %arg6: memref<56x256xbf16, #tpu.memory_space<vmem>>, %arg7: memref<1x128x256xf32, #tpu.memory_space<vmem>>, %arg8: memref<64x56xf32, #tpu.memory_space<vmem>>, %arg9: memref<128x56xbf16, #tpu.memory_space<vmem>>) attributes {dimension_semantics = [#tpu.dimension_semantics<parallel>, #tpu.dimension_semantics<arbitrary>], iteration_bounds = array<i64: 2, 2>, scalar_prefetch = 0 : i64, scratch_operands = 2 : i64, tpu.core_type = #tpu.core_type<tc>, window_params = [{transform_indices = @transform_0, window_bounds = array<i64: 1, 64, 256>}, {transform_indices = @transform_1, window_bounds = array<i64: 256, 56>}, {pipeline_mode = #tpu.pipeline_mode<synchronous>, transform_indices = @transform_2, window_bounds = array<i64: 128, 64>}, {pipeline_mode = #tpu.pipeline_mode<synchronous>, transform_indices = @transform_3, window_bounds = array<i64: 128, 56>}, {transform_indices = @transform_4, window_bounds = array<i64: 56, 256>}, {transform_indices = @transform_5, window_bounds = array<i64: 1, 128, 256>}]} {
    %c0_i32 = arith.constant 0 : i32
    %0 = arith.cmpi eq, %arg1, %c0_i32 : i32
    %1 = arith.extui %0 : i1 to i32
    %c0_i32_0 = arith.constant 0 : i32
    %2 = arith.cmpi ne, %1, %c0_i32_0 : i32
    scf.if %2 {
      %cst = arith.constant 0.000000e+00 : f32
      %12 = vector.broadcast %cst : f32 to vector<64x56xf32>
      %c0 = arith.constant 0 : index
      %c0_6 = arith.constant 0 : index
      %13 = vector.load %arg8[%c0, %c0_6] : memref<64x56xf32, #tpu.memory_space<vmem>>, vector<64x56xf32>
      tpu.vector_store %arg8[%c0, %c0_6], %12 {strides = array<i32>} : memref<64x56xf32, #tpu.memory_space<vmem>>, vector<64x56xf32>,
    } else {
    }
    %c1_i32 = arith.constant 1 : i32
    %3 = arith.cmpi slt, %arg1, %c1_i32 : i32
    %4 = arith.extui %3 : i1 to i32
    %c0_i32_1 = arith.constant 0 : i32
    %5 = arith.cmpi ne, %4, %c0_i32_1 : i32
    scf.if %5 {
      %c0 = arith.constant 0 : index
      %c0_6 = arith.constant 0 : index
      %12 = vector.load %arg8[%c0, %c0_6] : memref<64x56xf32, #tpu.memory_space<vmem>>, vector<64x56xf32>
      %c0_7 = arith.constant 0 : index
      %c0_8 = arith.constant 0 : index
      %c0_9 = arith.constant 0 : index
      %13 = vector.load %arg2[%c0_7, %c0_8, %c0_9] : memref<1x64x256xbf16, #tpu.memory_space<vmem>>, vector<1x64x256xbf16>
      %14 = vector.shape_cast %13 : vector<1x64x256xbf16> to vector<64x256xbf16>
      %c0_10 = arith.constant 0 : index
      %c0_11 = arith.constant 0 : index
      %15 = vector.load %arg3[%c0_10, %c0_11] : memref<256x56xbf16, #tpu.memory_space<vmem>>, vector<256x56xbf16>
      %cst = arith.constant dense<0.000000e+00> : vector<64x56xf32>
      %16 = tpu.matmul %14, %15, %cst {dimension_numbers = #tpu.dot_dimension_numbers<[1], [0], [0], [1], [0, 0, 1, 1], [], []>} : vector<64x256xbf16>, vector<256x56xbf16>, vector<64x56xf32> -> vector<64x56xf32>
      %17 = arith.addf %12, %16 : vector<64x56xf32>
      %c0_12 = arith.constant 0 : index
      %c0_13 = arith.constant 0 : index
      %18 = vector.load %arg8[%c0_12, %c0_13] : memref<64x56xf32, #tpu.memory_space<vmem>>, vector<64x56xf32>
      tpu.vector_store %arg8[%c0_12, %c0_13], %17 {strides = array<i32>} : memref<64x56xf32, #tpu.memory_space<vmem>>, vector<64x56xf32>,
    } else {
    }
    %c1_i32_2 = arith.constant 1 : i32
    %6 = arith.cmpi eq, %arg1, %c1_i32_2 : i32
    %7 = arith.extui %6 : i1 to i32
    %c0_i32_3 = arith.constant 0 : i32
    %8 = arith.cmpi ne, %7, %c0_i32_3 : i32
    scf.if %8 {
      %c0 = arith.constant 0 : index
      %c0_6 = arith.constant 0 : index
      %12 = vector.load %arg4[%c0, %c0_6] : memref<128x64xbf16, #tpu.memory_space<vmem>>, vector<128x64xbf16>
      %c0_7 = arith.constant 0 : index
      %c0_8 = arith.constant 0 : index
      %13 = vector.load %arg8[%c0_7, %c0_8] : memref<64x56xf32, #tpu.memory_space<vmem>>, vector<64x56xf32>
      %14 = arith.truncf %13 : vector<64x56xf32> to vector<64x56xbf16>
      %cst = arith.constant dense<0.000000e+00> : vector<128x56xf32>
      %15 = tpu.matmul %12, %14, %cst {dimension_numbers = #tpu.dot_dimension_numbers<[1], [0], [0], [1], [0, 0, 1, 1], [], []>} : vector<128x64xbf16>, vector<64x56xbf16>, vector<128x56xf32> -> vector<128x56xf32>
      %c0_9 = arith.constant 0 : index
      %c0_10 = arith.constant 0 : index
      %16 = vector.load %arg5[%c0_9, %c0_10] : memref<128x56xf32, #tpu.memory_space<vmem>>, vector<128x56xf32>
      %17 = arith.addf %15, %16 : vector<128x56xf32>
      %cst_11 = arith.constant 0.000000e+00 : f32
      %18 = vector.broadcast %cst_11 : f32 to vector<128x56xf32>
      %19 = arith.maximumf %17, %18 : vector<128x56xf32>
      %20 = arith.truncf %19 : vector<128x56xf32> to vector<128x56xbf16>
      %c0_12 = arith.constant 0 : index
      %c0_13 = arith.constant 0 : index
      %21 = vector.load %arg9[%c0_12, %c0_13] : memref<128x56xbf16, #tpu.memory_space<vmem>>, vector<128x56xbf16>
      tpu.vector_store %arg9[%c0_12, %c0_13], %20 {strides = array<i32>} : memref<128x56xbf16, #tpu.memory_space<vmem>>, vector<128x56xbf16>,
    } else {
    }
    %c1_i32_4 = arith.constant 1 : i32
    %9 = arith.cmpi sge, %arg1, %c1_i32_4 : i32
    %10 = arith.extui %9 : i1 to i32
    %c0_i32_5 = arith.constant 0 : i32
    %11 = arith.cmpi ne, %10, %c0_i32_5 : i32
    scf.if %11 {
      %c0 = arith.constant 0 : index
      %c0_6 = arith.constant 0 : index
      %12 = vector.load %arg9[%c0, %c0_6] : memref<128x56xbf16, #tpu.memory_space<vmem>>, vector<128x56xbf16>
      %c0_7 = arith.constant 0 : index
      %c0_8 = arith.constant 0 : index
      %13 = vector.load %arg6[%c0_7, %c0_8] : memref<56x256xbf16, #tpu.memory_space<vmem>>, vector<56x256xbf16>
      %cst = arith.constant dense<0.000000e+00> : vector<128x256xf32>
      %14 = tpu.matmul %12, %13, %cst {dimension_numbers = #tpu.dot_dimension_numbers<[1], [0], [0], [1], [0, 0, 1, 1], [], []>} : vector<128x56xbf16>, vector<56x256xbf16>, vector<128x256xf32> -> vector<128x256xf32>
      %c0_9 = arith.constant 0 : index
      %c0_10 = arith.constant 0 : index
      %c0_11 = arith.constant 0 : index
      %15 = vector.load %arg7[%c0_9, %c0_10, %c0_11] : memref<1x128x256xf32, #tpu.memory_space<vmem>>, vector<1x128x256xf32>
      %16 = vector.shape_cast %15 : vector<1x128x256xf32> to vector<128x256xf32>
      %17 = vector.shape_cast %14 : vector<128x256xf32> to vector<1x128x256xf32>
      tpu.vector_store %arg7[%c0_9, %c0_10, %c0_11], %17 {strides = array<i32>} : memref<1x128x256xf32, #tpu.memory_space<vmem>>, vector<1x128x256xf32>,
    } else {
    }
    return
  }
  func.func @transform_0(%arg0: i32, %arg1: i32) -> (i32, i32, i32) {
    %c0_i32 = arith.constant 0 : i32
    %0 = arith.minsi %arg1, %c0_i32 : i32
    %c0_i32_0 = arith.constant 0 : i32
    %c0_i32_1 = arith.constant 0 : i32
    return %arg0, %c0_i32_0, %0 : i32, i32, i32
  }
  func.func @transform_1(%arg0: i32, %arg1: i32) -> (i32, i32) {
    %c0_i32 = arith.constant 0 : i32
    %0 = arith.minsi %arg1, %c0_i32 : i32
    %c0_i32_0 = arith.constant 0 : i32
    %c0_i32_1 = arith.constant 0 : i32
    return %0, %c0_i32_0 : i32, i32
  }
  func.func @transform_2(%arg0: i32, %arg1: i32) -> (i32, i32) {
    %c0_i32 = arith.constant 0 : i32
    %c0_i32_0 = arith.constant 0 : i32
    %c0_i32_1 = arith.constant 0 : i32
    return %c0_i32, %c0_i32_0 : i32, i32
  }
  func.func @transform_3(%arg0: i32, %arg1: i32) -> (i32, i32) {
    %c0_i32 = arith.constant 0 : i32
    %c0_i32_0 = arith.constant 0 : i32
    %c0_i32_1 = arith.constant 0 : i32
    return %c0_i32, %c0_i32_0 : i32, i32
  }
  func.func @transform_4(%arg0: i32, %arg1: i32) -> (i32, i32) {
    %c1_i32 = arith.constant 1 : i32
    %0 = arith.subi %arg1, %c1_i32 : i32
    %c0_i32 = arith.constant 0 : i32
    %1 = arith.maxsi %0, %c0_i32 : i32
    %c0_i32_0 = arith.constant 0 : i32
    %c0_i32_1 = arith.constant 0 : i32
    return %c0_i32_0, %1 : i32, i32
  }
  func.func @transform_5(%arg0: i32, %arg1: i32) -> (i32, i32, i32) {
    %c1_i32 = arith.constant 1 : i32
    %0 = arith.subi %arg1, %c1_i32 : i32
    %c0_i32 = arith.constant 0 : i32
    %1 = arith.maxsi %0, %c0_i32 : i32
    %c0_i32_0 = arith.constant 0 : i32
    %c0_i32_1 = arith.constant 0 : i32
    return %arg0, %c0_i32_0, %1 : i32, i32, i32
  }
}

module attributes {stable_mosaic.version = 11 : i64} {
  func.func @_ppm_kernel(%arg0: i32, %arg1: i32, %arg2: memref<1x64x256xbf16, #tpu.memory_space<vmem>>, %arg3: memref<256x56xbf16, #tpu.memory_space<vmem>>, %arg4: memref<128x64xbf16, #tpu.memory_space<vmem>>, %arg5: memref<128x56xf32, #tpu.memory_space<vmem>>, %arg6: memref<56x256xbf16, #tpu.memory_space<vmem>>, %arg7: memref<1x128x256xf32, #tpu.memory_space<vmem>>, %arg8: memref<64x56xf32, #tpu.memory_space<vmem>>, %arg9: memref<128x56xbf16, #tpu.memory_space<vmem>>) attributes {dimension_semantics = [#tpu.dimension_semantics<parallel>, #tpu.dimension_semantics<arbitrary>], iteration_bounds = array<i64: 2, 2>, scalar_prefetch = 0 : i64, scratch_operands = 2 : i64, tpu.core_type = #tpu.core_type<tc>, window_params = [{transform_indices = @transform_0, window_bounds = array<i64: 1, 64, 256>}, {transform_indices = @transform_1, window_bounds = array<i64: 256, 56>}, {pipeline_mode = #tpu.pipeline_mode<synchronous>, transform_indices = @transform_2, window_bounds = array<i64: 128, 64>}, {pipeline_mode = #tpu.pipeline_mode<synchronous>, transform_indices = @transform_3, window_bounds = array<i64: 128, 56>}, {transform_indices = @transform_4, window_bounds = array<i64: 56, 256>}, {transform_indices = @transform_5, window_bounds = array<i64: 1, 128, 256>}]} {
    %c0_i32 = arith.constant 0 : i32
    %0 = arith.cmpi eq, %arg1, %c0_i32 : i32
    %1 = arith.extui %0 : i1 to i32
    %c0_i32_0 = arith.constant 0 : i32
    %2 = arith.cmpi ne, %1, %c0_i32_0 : i32
    scf.if %2 {
      %cst = arith.constant 0.000000e+00 : f32
      %12 = vector.broadcast %cst : f32 to vector<64x56xf32>
      %c0 = arith.constant 0 : index
      %c0_6 = arith.constant 0 : index
      %13 = vector.load %arg8[%c0, %c0_6] : memref<64x56xf32, #tpu.memory_space<vmem>>, vector<64x56xf32>
      tpu.vector_store %arg8[%c0, %c0_6], %12 {strides = array<i32>} : memref<64x56xf32, #tpu.memory_space<vmem>>, vector<64x56xf32>,
    } else {
    }
    %c1_i32 = arith.constant 1 : i32
    %3 = arith.cmpi slt, %arg1, %c1_i32 : i32
    %4 = arith.extui %3 : i1 to i32
    %c0_i32_1 = arith.constant 0 : i32
    %5 = arith.cmpi ne, %4, %c0_i32_1 : i32
    scf.if %5 {
      %c0 = arith.constant 0 : index
      %c0_6 = arith.constant 0 : index
      %12 = vector.load %arg8[%c0, %c0_6] : memref<64x56xf32, #tpu.memory_space<vmem>>, vector<64x56xf32>
      %c0_7 = arith.constant 0 : index
      %c0_8 = arith.constant 0 : index
      %c0_9 = arith.constant 0 : index
      %13 = vector.load %arg2[%c0_7, %c0_8, %c0_9] : memref<1x64x256xbf16, #tpu.memory_space<vmem>>, vector<1x64x256xbf16>
      %14 = vector.shape_cast %13 : vector<1x64x256xbf16> to vector<64x256xbf16>
      %c0_10 = arith.constant 0 : index
      %c0_11 = arith.constant 0 : index
      %15 = vector.load %arg3[%c0_10, %c0_11] : memref<256x56xbf16, #tpu.memory_space<vmem>>, vector<256x56xbf16>
      %cst = arith.constant dense<0.000000e+00> : vector<64x56xf32>
      %16 = tpu.matmul %14, %15, %cst {dimension_numbers = #tpu.dot_dimension_numbers<[1], [0], [0], [1], [0, 0, 1, 1], [], []>} : vector<64x256xbf16>, vector<256x56xbf16>, vector<64x56xf32> -> vector<64x56xf32>
      %17 = arith.addf %12, %16 : vector<64x56xf32>
      %c0_12 = arith.constant 0 : index
      %c0_13 = arith.constant 0 : index
      %18 = vector.load %arg8[%c0_12, %c0_13] : memref<64x56xf32, #tpu.memory_space<vmem>>, vector<64x56xf32>
      tpu.vector_store %arg8[%c0_12, %c0_13], %17 {strides = array<i32>} : memref<64x56xf32, #tpu.memory_space<vmem>>, vector<64x56xf32>,
    } else {
    }
    %c1_i32_2 = arith.constant 1 : i32
    %6 = arith.cmpi eq, %arg1, %c1_i32_2 : i32
    %7 = arith.extui %6 : i1 to i32
    %c0_i32_3 = arith.constant 0 : i32
    %8 = arith.cmpi ne, %7, %c0_i32_3 : i32
    scf.if %8 {
      %c0 = arith.constant 0 : index
      %c0_6 = arith.constant 0 : index
      %12 = vector.load %arg4[%c0, %c0_6] : memref<128x64xbf16, #tpu.memory_space<vmem>>, vector<128x64xbf16>
      %c0_7 = arith.constant 0 : index
      %c0_8 = arith.constant 0 : index
      %13 = vector.load %arg8[%c0_7, %c0_8] : memref<64x56xf32, #tpu.memory_space<vmem>>, vector<64x56xf32>
      %14 = arith.truncf %13 : vector<64x56xf32> to vector<64x56xbf16>
      %cst = arith.constant dense<0.000000e+00> : vector<128x56xf32>
      %15 = tpu.matmul %12, %14, %cst {dimension_numbers = #tpu.dot_dimension_numbers<[1], [0], [0], [1], [0, 0, 1, 1], [], []>} : vector<128x64xbf16>, vector<64x56xbf16>, vector<128x56xf32> -> vector<128x56xf32>
      %c0_9 = arith.constant 0 : index
      %c0_10 = arith.constant 0 : index
      %16 = vector.load %arg5[%c0_9, %c0_10] : memref<128x56xf32, #tpu.memory_space<vmem>>, vector<128x56xf32>
      %17 = arith.addf %15, %16 : vector<128x56xf32>
      %cst_11 = arith.constant 0.000000e+00 : f32
      %18 = vector.broadcast %cst_11 : f32 to vector<128x56xf32>
      %19 = arith.maximumf %17, %18 : vector<128x56xf32>
      %20 = arith.truncf %19 : vector<128x56xf32> to vector<128x56xbf16>
      %c0_12 = arith.constant 0 : index
      %c0_13 = arith.constant 0 : index
      %21 = vector.load %arg9[%c0_12, %c0_13] : memref<128x56xbf16, #tpu.memory_space<vmem>>, vector<128x56xbf16>
      tpu.vector_store %arg9[%c0_12, %c0_13], %20 {strides = array<i32>} : memref<128x56xbf16, #tpu.memory_space<vmem>>, vector<128x56xbf16>,
    } else {
    }
    %c1_i32_4 = arith.constant 1 : i32
    %9 = arith.cmpi sge, %arg1, %c1_i32_4 : i32
    %10 = arith.extui %9 : i1 to i32
    %c0_i32_5 = arith.constant 0 : i32
    %11 = arith.cmpi ne, %10, %c0_i32_5 : i32
    scf.if %11 {
      %c0 = arith.constant 0 : index
      %c0_6 = arith.constant 0 : index
      %12 = vector.load %arg9[%c0, %c0_6] : memref<128x56xbf16, #tpu.memory_space<vmem>>, vector<128x56xbf16>
      %c0_7 = arith.constant 0 : index
      %c0_8 = arith.constant 0 : index
      %13 = vector.load %arg6[%c0_7, %c0_8] : memref<56x256xbf16, #tpu.memory_space<vmem>>, vector<56x256xbf16>
      %cst = arith.constant dense<0.000000e+00> : vector<128x256xf32>
      %14 = tpu.matmul %12, %13, %cst {dimension_numbers = #tpu.dot_dimension_numbers<[1], [0], [0], [1], [0, 0, 1, 1], [], []>} : vector<128x56xbf16>, vector<56x256xbf16>, vector<128x256xf32> -> vector<128x256xf32>
      %c0_9 = arith.constant 0 : index
      %c0_10 = arith.constant 0 : index
      %c0_11 = arith.constant 0 : index
      %15 = vector.load %arg7[%c0_9, %c0_10, %c0_11] : memref<1x128x256xf32, #tpu.memory_space<vmem>>, vector<1x128x256xf32>
      %16 = vector.shape_cast %15 : vector<1x128x256xf32> to vector<128x256xf32>
      %17 = vector.shape_cast %14 : vector<128x256xf32> to vector<1x128x256xf32>
      tpu.vector_store %arg7[%c0_9, %c0_10, %c0_11], %17 {strides = array<i32>} : memref<1x128x256xf32, #tpu.memory_space<vmem>>, vector<1x128x256xf32>,
    } else {
    }
    return
  }
  func.func @transform_0(%arg0: i32, %arg1: i32) -> (i32, i32, i32) {
    %c0_i32 = arith.constant 0 : i32
    %0 = arith.minsi %arg1, %c0_i32 : i32
    %c0_i32_0 = arith.constant 0 : i32
    %c0_i32_1 = arith.constant 0 : i32
    return %arg0, %c0_i32_0, %0 : i32, i32, i32
  }
  func.func @transform_1(%arg0: i32, %arg1: i32) -> (i32, i32) {
    %c0_i32 = arith.constant 0 : i32
    %0 = arith.minsi %arg1, %c0_i32 : i32
    %c0_i32_0 = arith.constant 0 : i32
    %c0_i32_1 = arith.constant 0 : i32
    return %0, %c0_i32_0 : i32, i32
  }
  func.func @transform_2(%arg0: i32, %arg1: i32) -> (i32, i32) {
    %c0_i32 = arith.constant 0 : i32
    %c0_i32_0 = arith.constant 0 : i32
    %c0_i32_1 = arith.constant 0 : i32
    return %c0_i32, %c0_i32_0 : i32, i32
  }
  func.func @transform_3(%arg0: i32, %arg1: i32) -> (i32, i32) {
    %c0_i32 = arith.constant 0 : i32
    %c0_i32_0 = arith.constant 0 : i32
    %c0_i32_1 = arith.constant 0 : i32
    return %c0_i32, %c0_i32_0 : i32, i32
  }
  func.func @transform_4(%arg0: i32, %arg1: i32) -> (i32, i32) {
    %c1_i32 = arith.constant 1 : i32
    %0 = arith.subi %arg1, %c1_i32 : i32
    %c0_i32 = arith.constant 0 : i32
    %1 = arith.maxsi %0, %c0_i32 : i32
    %c0_i32_0 = arith.constant 0 : i32
    %c0_i32_1 = arith.constant 0 : i32
    return %c0_i32_0, %1 : i32, i32
  }
  func.func @transform_5(%arg0: i32, %arg1: i32) -> (i32, i32, i32) {
    %c1_i32 = arith.constant 1 : i32
    %0 = arith.subi %arg1, %c1_i32 : i32
    %c0_i32 = arith.constant 0 : i32
    %1 = arith.maxsi %0, %c0_i32 : i32
    %c0_i32_0 = arith.constant 0 : i32
    %c0_i32_1 = arith.constant 0 : i32
    return %arg0, %c0_i32_0, %1 : i32, i32, i32
  }
}

</mosaic_0001>

<bundles_post_ra>
// kernel: ppm_forward.1
= control target key start
LH: loop header
LB: loop body
LE: loop exit
PB: predicated region body
PF: predicated region fallthrough
CT: control target
= control target key end

     0   :  { %s1676_s18 = smov 0   ;;  %s1678_s19 = smov 0   ;;  %s1947_s0 = inlined_call_operand.vmem [shape: bf16[2,64,256], index: 0, kind: input, shape index: {}]   ;;  %s1948_s1 = inlined_call_operand.vmem [shape: bf16[256,56], index: 1, kind: input, shape index: {}]   ;;  %s1949_s2 = inlined_call_operand.vmem [shape: bf16[128,64], index: 2, kind: input, shape index: {}]   ;;  %s1950_s3 = inlined_call_operand.vmem [shape: f32[128,56], index: 3, kind: input, shape index: {}]   ;;  %s1951_s4 = inlined_call_operand.vmem [shape: bf16[56,256], index: 4, kind: input, shape index: {}]   ;;  %s1952_s5 = inlined_call_operand.vmem [shape: f32[2,128,256], index: 5, kind: output, shape index: {}]  }
   0x1   :  { %s1680_s20 = smov 0   ;;  %s1682_s21 = smov 0  }
   0x2   :  { %s1684_s22 = smov 0  }
   0x3 LB: > { %s24_s23 = sadd.s32 1, %s1635_s20  ;;  %s27_s24 = sadd.s32 1, %s1639_s21  ;;  %s1643_s22 = sphi %s1684_s22, %s15_s22   ;;  %s1639_s21 = sphi %s1682_s21, %s1956_s21   ;;  %s1635_s20 = sphi %s1680_s20, %s1955_s20   ;;  %s1631_s19 = sphi %s1678_s19, %s1954_s19   ;;  %s1627_s18 = sphi %s1676_s18, %s1953_s18  }
   0x4   : > { %p25_p0 = scmp.ge.s32.totalorder %s24_s23, 2  ;;  %p1255_p1 = scmp.ge.s32.totalorder %s1643_s22, 1 }
   0x5   : > { %p264_p2 = scmp.lt.s32.totalorder %s1643_s22, 5 }
   0x6   : > { %s1958_s23 = smov (%p25_p0, %s24_s23), 0  ;;  %s1960_s24 = smov (!%p25_p0, %s27_s24), %s1639_s21 }
   0x7   : > { %p265_p3 = pnand %p1255_p1, %p264_p2  ;;  %p29_p4 = scmp.ge.s32.totalorder %s1960_s24, 2 }
   0x8   : > { %p320_p5 = scmp.lt.s32.totalorder (!%p265_p3), %s1627_s18, 0  ;;  %p323_p6 = scmp.lt.s32.totalorder (!%p265_p3), %s1631_s19, 1 }
   0x9   : > { %s1962_s24 = smov (%p29_p4, %s1960_s24), 0  ;;  %268 = sbr.rel (%p265_p3) target bundleno = 649 (0x289), region = 40 }
   0xa   : > { %s1261_s25 = sadd.s32 (!%p265_p3), 4294967295, %s1627_s18  ;;  %p1268_p11 = scmp.ne.s32.totalorder (!%p265_p3), %s1627_s18, 0 }
   0xb   : > { %p345_p9 = scmp.gt.s32.totalorder (!%p265_p3), %s1261_s25, 0 }
   0xe   : > { %s321_s26 = scalar_select %p320_p5, %s1627_s18, 0 }
   0xf   : > { %s1964_s19 = smov (!%p323_p6, %s1631_s19), 1  ;;  %s1970_s25 = smov (!%p345_p9, %s1261_s25), 0 }
  0x10   : > { %s1256_s27 = sshll.u32 %s321_s26, 1  ;;  %s1259_s28 = sshll.u32 %s321_s26, 5 }
  0x11   : > { %p325_p7 = scmp.lt.s32.totalorder %s1256_s27, 1  ;;  %s1257_s29 = sshll.u32 %s1964_s19, 4 }
  0x12   : > { %p337_p8 = scmp.lt.s32.totalorder %s1259_s28, 31  ;;  %s1262_s14 = sshll.u32 %s1970_s25, 1 }
  0x13   : > { %s1966_s27 = smov (!%p325_p7, %s1256_s27), 1  ;;  %p348_p10 = scmp.lt.s32.totalorder %s1262_s14, 1 }
  0x14   : > { %s1968_s28 = smov (!%p337_p8, %s1259_s28), 31  ;;  %s328_s30 = sadd.s32 %s1257_s29, %s1966_s27 }
  0x15   : > { %s1258_s6 = sshll.u32 %s328_s30, 2  ;;  %s1260_s7 = sshll.u32 %s1968_s28, 2 }
  0x16   : > { %s1714_s10 = scalar_lea.vmem %s1947_s0, %s1258_s6  ;;  %s1719_s13 = scalar_lea.vmem %s1948_s1, %s1260_s7 }
  0x17   : > { %s1266_s15 = sshll.u32 %s1964_s19, 5  ;;  %s1972_s14 = smov (!%p348_p10, %s1262_s14), 1 }
  0x18   : > { %s1263_s16 = sshll.u32 %s1972_s14, 2  ;;  %s365_s17 = sadd.s32 %s1266_s15, %s1972_s14 }
  0x19   : > { %s1724_s28 = scalar_lea.vmem %s1951_s4, %s1263_s16  ;;  %s1267_s29 = sshll.u32 %s365_s17, 3 }
  0x1a   : > { %s1729_s8 = scalar_lea.vmem %s1952_s5, %s1267_s29  ;;  %376 = sbr.rel (%p1268_p11) target bundleno = 40 (0x28), region = 44 }
  0x1f   : > { %vm377_vm0 = vcmask 457728   ;;  %v1645_v0 = vmov 0.0  }
  0x20   : > { %378 = vst.msk [vmem:[#allocation2] sm:$0xff] %vm377_vm0, %v1645_v0 }
  0x21   : > { %379 = vst.msk [vmem:[#allocation2 + $0x8] sm:$0xff] %vm377_vm0, %v1645_v0 }
  0x22   : > { %380 = vst.msk [vmem:[#allocation2 + $0x10] sm:$0xff] %vm377_vm0, %v1645_v0 }
  0x23   : > { %381 = vst.msk [vmem:[#allocation2 + $0x18] sm:$0xff] %vm377_vm0, %v1645_v0 }
  0x24   : > { %382 = vst.msk [vmem:[#allocation2 + $0x20] sm:$0xff] %vm377_vm0, %v1645_v0 }
  0x25   : > { %383 = vst.msk [vmem:[#allocation2 + $0x28] sm:$0xff] %vm377_vm0, %v1645_v0 }
  0x26   : > { %384 = vst.msk [vmem:[#allocation2 + $0x30] sm:$0xff] %vm377_vm0, %v1645_v0 }
  0x27   : > { %385 = vst.msk [vmem:[#allocation2 + $0x38] sm:$0xff] %vm377_vm0, %v1645_v0 }
  0x28 PF: > { %p1269_p12 = scmp.ge.s32.totalorder %s1627_s18, 1 }
  0x2a   : > { %389 = sbr.rel (%p1269_p12) target bundleno = 241 (0xf1), region = 48 }
  0x2f   : > { %v1497_v1 = vld [vmem:[%s1719_s13 + $0x38] sm:$0xff]  ;;  %v1496_v3 = vld [vmem:[%s1719_s13 + $0x30] sm:$0xff]  ;;  %v1495_v5 = vld [vmem:[%s1719_s13 + $0x28] sm:$0xff]  ;;  %vm640_vm1 = vcmask 457728  }
  0x30   : > { %v1505_v2 = vld [vmem:[%s1719_s13 + $0x78] sm:$0xff]  ;;  %574 = vmatpush.bf16.msra.mxu0 %v1497_v1  ;;  %1528 = vmatpush.bf16.msra.mxu2 %v1497_v1  ;;  %v1504_v4 = vld [vmem:[%s1719_s13 + $0x70] sm:$0xff]  ;;  %v1503_v6 = vld [vmem:[%s1719_s13 + $0x68] sm:$0xff] }
  0x31   : > { %603 = vmatpush.bf16.msra.mxu1 %v1505_v2  ;;  %1536 = vmatpush.bf16.msra.mxu3 %v1505_v2  ;;  %v1494_v7 = vld [vmem:[%s1719_s13 + $0x20] sm:$0xff]  ;;  %v1493_v9 = vld [vmem:[%s1719_s13 + $0x18] sm:$0xff]  ;;  %v1492_v11 = vld [vmem:[%s1719_s13 + $0x10] sm:$0xff] }
  0x32   : > { %v1502_v8 = vld [vmem:[%s1719_s13 + $0x60] sm:$0xff]  ;;  %v1501_v10 = vld [vmem:[%s1719_s13 + $0x58] sm:$0xff]  ;;  %v1500_v12 = vld [vmem:[%s1719_s13 + $0x50] sm:$0xff] }
  0x33   : > { %v1491_v13 = vld [vmem:[%s1719_s13 + $0x8] sm:$0xff]  ;;  %v1490_v15 = vld [vmem:[%s1719_s13] sm:$0xff]  ;;  %v1280_v29 = vld [vmem:[%s1714_s10 + $0x10] sm:$0xf] }
  0x34   : > { %575 = vmatpush.bf16.msra.mxu0 %v1496_v3  ;;  %1529 = vmatpush.bf16.msra.mxu2 %v1496_v3  ;;  %v1499_v14 = vld [vmem:[%s1719_s13 + $0x48] sm:$0xff]  ;;  %v1498_v16 = vld [vmem:[%s1719_s13 + $0x40] sm:$0xff]  ;;  %v1485_v30 = vld [vmem:[%s1714_s10 + $0x14] sm:$0xf0] }
  0x35   : > { %604 = vmatpush.bf16.msra.mxu1 %v1504_v4  ;;  %1537 = vmatpush.bf16.msra.mxu3 %v1504_v4  ;;  %v1272_v17 = vld [vmem:[%s1714_s10] sm:$0xf]  ;;  %v1483_v18 = vld [vmem:[%s1714_s10 + $0x4] sm:$0xf0]  ;;  %v1482_v21 = vld [vmem:[%s1714_s10 + $0x4] sm:$0xf]  ;;  %v1281_v37 = vor.u32 %v1485_v30, %v1280_v29 }
  0x36   : > { %v1288_v19 = vld [vmem:[%s1714_s10 + $0x20] sm:$0xf]  ;;  %v1487_v20 = vld [vmem:[%s1714_s10 + $0x24] sm:$0xf0]  ;;  %v1274_v22 = vld [vmem:[%s1714_s10 + $0x8] sm:$0xf0]  ;;  %v1273_v25 = vor.u32 %v1483_v18, %v1272_v17 }
  0x37   : > { %v1486_v23 = vld [vmem:[%s1714_s10 + $0x24] sm:$0xf]  ;;  %v1290_v24 = vld [vmem:[%s1714_s10 + $0x28] sm:$0xf0]  ;;  %v1289_v26 = vor.u32 %v1487_v20, %v1288_v19  ;;  %v1277_v27 = vor.u32 %v1482_v21, %v1274_v22  ;;  %v1296_v31 = vld [vmem:[%s1714_s10 + $0x30] sm:$0xf] }
  0x38   : > { %576 = vmatpush.bf16.msra.mxu0 %v1495_v5  ;;  %1530 = vmatpush.bf16.msra.mxu2 %v1495_v5  ;;  %v1293_v28 = vor.u32 %v1486_v23, %v1290_v24  ;;  %v1489_v32 = vld [vmem:[%s1714_s10 + $0x34] sm:$0xf0]  ;;  %v1484_v33 = vld [vmem:[%s1714_s10 + $0x14] sm:$0xf]  ;;  %v1282_v34 = vld [vmem:[%s1714_s10 + $0x18] sm:$0xf0] }
  0x39   : > { %605 = vmatpush.bf16.msra.mxu1 %v1503_v6  ;;  %1538 = vmatpush.bf16.msra.mxu3 %v1503_v6  ;;  %v1488_v35 = vld [vmem:[%s1714_s10 + $0x34] sm:$0xf]  ;;  %v1298_v36 = vld [vmem:[%s1714_s10 + $0x38] sm:$0xf0]  ;;  %v1297_v38 = vor.u32 %v1489_v32, %v1296_v31  ;;  %v1285_v39 = vor.u32 %v1484_v33, %v1282_v34  ;;  %v390_v42 = vld [vmem:[#allocation2] sm:$0xff] }
  0x3a   : > { %v1301_v40 = vor.u32 %v1488_v35, %v1298_v36  ;;  %v394_v47 = vld [vmem:[#allocation2 + $0x20] sm:$0xff]  ;;  %v391_v51 = vld [vmem:[#allocation2 + $0x8] sm:$0xff]  ;;  %v392_v61 = vld [vmem:[#allocation2 + $0x10] sm:$0xff] }
  0x3b   : > { %v395_v57 = vld [vmem:[#allocation2 + $0x28] sm:$0xff]  ;;  %v396_v3 = vld [vmem:[#allocation2 + $0x30] sm:$0xff] }
  0x3c   : > { %577 = vmatpush.bf16.msra.mxu0 %v1494_v7  ;;  %1531 = vmatpush.bf16.msra.mxu2 %v1494_v7  ;;  %v393_v7 = vld [vmem:[#allocation2 + $0x18] sm:$0xff] }
  0x3d   : > { %606 = vmatpush.bf16.msra.mxu1 %v1502_v8  ;;  %1539 = vmatpush.bf16.msra.mxu3 %v1502_v8 }
  0x40   : > { %578 = vmatpush.bf16.msra.mxu0 %v1493_v9  ;;  %1532 = vmatpush.bf16.msra.mxu2 %v1493_v9 }
  0x41   : > { %607 = vmatpush.bf16.msra.mxu1 %v1501_v10  ;;  %1540 = vmatpush.bf16.msra.mxu3 %v1501_v10 }
  0x44   : > { %579 = vmatpush.bf16.msra.mxu0 %v1492_v11  ;;  %1533 = vmatpush.bf16.msra.mxu2 %v1492_v11 }
  0x45   : > { %608 = vmatpush.bf16.msra.mxu1 %v1500_v12  ;;  %1541 = vmatpush.bf16.msra.mxu3 %v1500_v12 }
  0x48   : > { %580 = vmatpush.bf16.msra.mxu0 %v1491_v13  ;;  %1534 = vmatpush.bf16.msra.mxu2 %v1491_v13  ;;  %v397_v13 = vld [vmem:[#allocation2 + $0x38] sm:$0xff] }
  0x49   : > { %609 = vmatpush.bf16.msra.mxu1 %v1499_v14  ;;  %1542 = vmatpush.bf16.msra.mxu3 %v1499_v14 }
  0x4c   : > { %581 = vmatpush.bf16.msra.mxu0 %v1490_v15  ;;  %1535 = vmatpush.bf16.msra.mxu2 %v1490_v15 }
  0x4d   : > { %610 = vmatpush.bf16.msra.mxu1 %v1498_v16  ;;  %1543 = vmatpush.bf16.msra.mxu3 %v1498_v16 }
  0x4f   : > { %582 = vmatmul.bf16.vlgmr.msra.gmra.mxu0 %v1273_v25  ;;  %592 = vmatmul.bf16.vlgmr.msra.gmra.mxu2 %v1289_v26 }
  0x50   : > { %611 = vmatmul.bf16.vlgmr.msra.gmra.mxu1 %v1277_v27  ;;  %621 = vmatmul.bf16.vlgmr.msra.gmra.mxu3 %v1293_v28 }
  0x5f   : > { %587 = vmatmul.bf16.gmra.mxu0 %v1281_v37  ;;  %597 = vmatmul.bf16.gmra.mxu2 %v1297_v38 }
  0x60   : > { %616 = vmatmul.bf16.gmra.mxu1 %v1285_v39  ;;  %626 = vmatmul.bf16.gmra.mxu3 %v1301_v40 }
  0xcc   : > { %v583_v41 = vpop.f32.mrf.mxu0 }
  0xcd   : > { %v612_v43 = vpop.f32.mrf.mxu1 }
  0xce   : > { %v613_v44 = vadd.f32 %v612_v43, %v583_v41 }
  0xd0   : > { %v632_v45 = vadd.f32 %v613_v44, %v390_v42 }
  0xd2   : > { %641 = vst.msk [vmem:[#allocation2] sm:$0xff] %vm640_vm1, %v632_v45  ;;  %v593_v46 = vpop.f32.mrf.mxu2 }
  0xd3   : > { %v622_v48 = vpop.f32.mrf.mxu3 }
  0xd4   : > { %v623_v49 = vadd.f32 %v622_v48, %v593_v46  ;;  %v585_v50 = vpop.f32.mrf.mxu0 }
  0xd5   : > { %v614_v52 = vpop.f32.mrf.mxu1 }
  0xd6   : > { %v636_v53 = vadd.f32 %v623_v49, %v394_v47  ;;  %v615_v54 = vadd.f32 %v614_v52, %v585_v50 }
  0xd8   : > { %645 = vst.msk [vmem:[#allocation2 + $0x20] sm:$0xff] %vm640_vm1, %v636_v53  ;;  %v633_v55 = vadd.f32 %v615_v54, %v391_v51 }
  0xda   : > { %642 = vst.msk [vmem:[#allocation2 + $0x8] sm:$0xff] %vm640_vm1, %v633_v55  ;;  %v595_v56 = vpop.f32.mrf.mxu2 }
  0xdb   : > { %v624_v58 = vpop.f32.mrf.mxu3 }
  0xdc   : > { %v625_v59 = vadd.f32 %v624_v58, %v595_v56  ;;  %v588_v60 = vpop.f32.mrf.mxu0 }
  0xdd   : > { %v617_v62 = vpop.f32.mrf.mxu1 }
  0xde   : > { %v637_v63 = vadd.f32 %v625_v59, %v395_v57  ;;  %v618_v0 = vadd.f32 %v617_v62, %v588_v60 }
  0xe0   : > { %646 = vst.msk [vmem:[#allocation2 + $0x28] sm:$0xff] %vm640_vm1, %v637_v63  ;;  %v634_v1 = vadd.f32 %v618_v0, %v392_v61 }
  0xe2   : > { %643 = vst.msk [vmem:[#allocation2 + $0x10] sm:$0xff] %vm640_vm1, %v634_v1  ;;  %v598_v2 = vpop.f32.mrf.mxu2 }
  0xe3   : > { %v627_v4 = vpop.f32.mrf.mxu3 }
  0xe4   : > { %v628_v5 = vadd.f32 %v627_v4, %v598_v2  ;;  %v590_v6 = vpop.f32.mrf.mxu0 }
  0xe5   : > { %v619_v8 = vpop.f32.mrf.mxu1 }
  0xe6   : > { %v638_v9 = vadd.f32 %v628_v5, %v396_v3  ;;  %v620_v10 = vadd.f32 %v619_v8, %v590_v6 }
  0xe8   : > { %647 = vst.msk [vmem:[#allocation2 + $0x30] sm:$0xff] %vm640_vm1, %v638_v9  ;;  %v635_v11 = vadd.f32 %v620_v10, %v393_v7 }
  0xea   : > { %644 = vst.msk [vmem:[#allocation2 + $0x18] sm:$0xff] %vm640_vm1, %v635_v11  ;;  %v600_v12 = vpop.f32.mrf.mxu2 }
  0xeb   : > { %v629_v14 = vpop.f32.mrf.mxu3 }
  0xec   : > { %v630_v15 = vadd.f32 %v629_v14, %v600_v12 }
  0xee   : > { %v639_v16 = vadd.f32 %v630_v15, %v397_v13 }
  0xf0   : > { %648 = vst.msk [vmem:[#allocation2 + $0x38] sm:$0xff] %vm640_vm1, %v639_v16 }
  0xf1 PF: > { %p1366_p13 = scmp.ne.s32.totalorder %s1627_s18, 1 }
  0xf3   : > { %652 = sbr.rel (%p1366_p13) target bundleno = 431 (0x1af), region = 52 }
  0xf8   : > { %v675_v17 = vld [vmem:[#allocation2 + $0x30] sm:$0xff]  ;;  %v676_v18 = vld [vmem:[#allocation2 + $0x38] sm:$0xff]  ;;  %v673_v19 = vld [vmem:[#allocation2 + $0x20] sm:$0xff]  ;;  %vm737_vm2 = vcmask 523264   ;;  %vm843_vm3 = vcmask 453632  }
  0xf9   : > { %v680_v20 = vpack.c.bf16 %v676_v18, %v675_v17  ;;  %v674_v21 = vld [vmem:[#allocation2 + $0x28] sm:$0xff]  ;;  %v671_v23 = vld [vmem:[#allocation2 + $0x10] sm:$0xff]  ;;  %v672_v24 = vld [vmem:[#allocation2 + $0x18] sm:$0xff] }
  0xfa   : > { %v679_v22 = vpack.c.bf16 %v674_v21, %v673_v19  ;;  %v678_v25 = vpack.c.bf16 %v672_v24, %v671_v23  ;;  %v669_v26 = vld [vmem:[#allocation2] sm:$0xff]  ;;  %v670_v27 = vld [vmem:[#allocation2 + $0x8] sm:$0xff]  ;;  %v1508_v30 = vld [vmem:[%s1949_s2 + $0x10] sm:$0xff] }
  0xfb   : > { %766 = vmatpush.bf16.msra.mxu0 %v680_v20  ;;  %1544 = vmatpush.bf16.msra.mxu1 %v680_v20  ;;  %v677_v28 = vpack.c.bf16 %v670_v27, %v669_v26  ;;  %v1506_v29 = vld [vmem:[%s1949_s2] sm:$0xff]  ;;  %v1512_v32 = vld [vmem:[%s1949_s2 + $0x30] sm:$0xff]  ;;  %v1507_v33 = vld [vmem:[%s1949_s2 + $0x8] sm:$0xff] }
  0xfc   : > { %1545 = vmatpush.bf16.msra.mxu2 %v680_v20  ;;  %1546 = vmatpush.bf16.msra.mxu3 %v680_v20  ;;  %v1510_v31 = vld [vmem:[%s1949_s2 + $0x20] sm:$0xff]  ;;  %v1509_v34 = vld [vmem:[%s1949_s2 + $0x18] sm:$0xff]  ;;  %v1511_v35 = vld [vmem:[%s1949_s2 + $0x28] sm:$0xff] }
  0xfd   : > { %v1513_v36 = vld [vmem:[%s1949_s2 + $0x38] sm:$0xff]  ;;  %v681_v37 = vld [vmem:[%s1950_s3] sm:$0xff]  ;;  %v682_v49 = vld [vmem:[%s1950_s3 + $0x8] sm:$0xff] }
  0xfe   : > { %v685_v38 = vld [vmem:[%s1950_s3 + $0x20] sm:$0xff]  ;;  %v686_v50 = vld [vmem:[%s1950_s3 + $0x28] sm:$0xff]  ;;  %v683_v5 = vld [vmem:[%s1950_s3 + $0x10] sm:$0xff] }
  0xff   : > { %767 = vmatpush.bf16.msra.mxu0 %v679_v22  ;;  %1547 = vmatpush.bf16.msra.mxu1 %v679_v22  ;;  %v689_v47 = vld [vmem:[%s1950_s3 + $0x40] sm:$0xff]  ;;  %v690_v3 = vld [vmem:[%s1950_s3 + $0x48] sm:$0xff]  ;;  %v687_v6 = vld [vmem:[%s1950_s3 + $0x30] sm:$0xff] }
 0x100   : > { %1548 = vmatpush.bf16.msra.mxu2 %v679_v22  ;;  %1549 = vmatpush.bf16.msra.mxu3 %v679_v22  ;;  %v693_v48 = vld [vmem:[%s1950_s3 + $0x60] sm:$0xff]  ;;  %v694_v4 = vld [vmem:[%s1950_s3 + $0x68] sm:$0xff]  ;;  %v691_v23 = vld [vmem:[%s1950_s3 + $0x50] sm:$0xff] }
 0x101   : > { %v695_v24 = vld [vmem:[%s1950_s3 + $0x70] sm:$0xff]  ;;  %v688_v26 = vld [vmem:[%s1950_s3 + $0x38] sm:$0xff] }
 0x103   : > { %768 = vmatpush.bf16.msra.mxu0 %v678_v25  ;;  %1550 = vmatpush.bf16.msra.mxu1 %v678_v25 }
 0x104   : > { %1551 = vmatpush.bf16.msra.mxu2 %v678_v25  ;;  %1552 = vmatpush.bf16.msra.mxu3 %v678_v25  ;;  %v684_v25 = vld [vmem:[%s1950_s3 + $0x18] sm:$0xff] }
 0x107   : > { %769 = vmatpush.bf16.msra.mxu0 %v677_v28  ;;  %1553 = vmatpush.bf16.msra.mxu1 %v677_v28 }
 0x108   : > { %1554 = vmatpush.bf16.msra.mxu2 %v677_v28  ;;  %1555 = vmatpush.bf16.msra.mxu3 %v677_v28 }
 0x10a   : > { %1399 = vmatmul.msk.bf16.vlgmr.msra.gmra.mxu0 %vm737_vm2, %v1506_v29  ;;  %1401 = vmatmul.msk.bf16.vlgmr.msra.gmra.mxu1 %vm737_vm2, %v1508_v30 }
 0x10b   : > { %1403 = vmatmul.msk.bf16.vlgmr.msra.gmra.mxu2 %vm737_vm2, %v1510_v31  ;;  %1405 = vmatmul.msk.bf16.vlgmr.msra.gmra.mxu3 %vm737_vm2, %v1512_v32 }
 0x11a   : > { %1400 = vmatmul.msk.bf16.gmra.mxu0 %vm737_vm2, %v1507_v33  ;;  %1402 = vmatmul.msk.bf16.gmra.mxu1 %vm737_vm2, %v1509_v34 }
 0x11b   : > { %1404 = vmatmul.msk.bf16.gmra.mxu2 %vm737_vm2, %v1511_v35  ;;  %1406 = vmatmul.msk.bf16.gmra.mxu3 %vm737_vm2, %v1513_v36 }
 0x187   : > { %v771_v39 = vpop.f32.mrf.mxu0  ;;  %v781_v40 = vpop.f32.mrf.mxu1 }
 0x188   : > { %v772_v41 = vadd.f32 %v771_v39, %v681_v37  ;;  %v782_v42 = vadd.f32 %v781_v40, %v685_v38 }
 0x18a   : > { %v811_v43 = vmax.f32 %v772_v41, 0.0  ;;  %v815_v44 = vmax.f32 %v782_v42, 0.0 }
 0x18c   : > { %v827_v45 = vpack.c.bf16 %v811_v43, %v811_v43  ;;  %v831_v46 = vpack.c.bf16 %v815_v44, %v815_v44  ;;  %v692_v43 = vld [vmem:[%s1950_s3 + $0x58] sm:$0xff] }
 0x18d   : > { %v696_v44 = vld [vmem:[%s1950_s3 + $0x78] sm:$0xff] }
 0x18e   : > { %844 = vst.msk [vmem:[#allocation3] sm:$0xf] %vm843_vm3, %v827_v45  ;;  %v791_v51 = vpop.f32.mrf.mxu2  ;;  %v801_v52 = vpop.f32.mrf.mxu3 }
 0x18f   : > { %848 = vst.msk [vmem:[#allocation3 + $0x10] sm:$0xf] %vm843_vm3, %v831_v46  ;;  %v792_v53 = vadd.f32 %v791_v51, %v689_v47  ;;  %v802_v54 = vadd.f32 %v801_v52, %v693_v48  ;;  %v773_v55 = vpop.f32.mrf.mxu0  ;;  %v783_v56 = vpop.f32.mrf.mxu1 }
 0x190   : > { %v774_v57 = vadd.f32 %v773_v55, %v682_v49  ;;  %v784_v58 = vadd.f32 %v783_v56, %v686_v50 }
 0x191   : > { %v819_v59 = vmax.f32 %v792_v53, 0.0  ;;  %v823_v60 = vmax.f32 %v802_v54, 0.0 }
 0x192   : > { %v812_v61 = vmax.f32 %v774_v57, 0.0  ;;  %v816_v62 = vmax.f32 %v784_v58, 0.0 }
 0x193   : > { %v835_v63 = vpack.c.bf16 %v819_v59, %v819_v59  ;;  %v839_v0 = vpack.c.bf16 %v823_v60, %v823_v60 }
 0x194   : > { %v828_v1 = vpack.c.bf16 %v812_v61, %v812_v61  ;;  %v832_v2 = vpack.c.bf16 %v816_v62, %v816_v62 }
 0x195   : > { %852 = vst.msk [vmem:[#allocation3 + $0x20] sm:$0xf] %vm843_vm3, %v835_v63 }
 0x196   : > { %856 = vst.msk [vmem:[#allocation3 + $0x30] sm:$0xf] %vm843_vm3, %v839_v0  ;;  %v793_v7 = vpop.f32.mrf.mxu2  ;;  %v803_v8 = vpop.f32.mrf.mxu3 }
 0x197   : > { %845 = vst.msk [vmem:[#allocation3 + $0x4] sm:$0xf] %vm843_vm3, %v828_v1  ;;  %v794_v9 = vadd.f32 %v793_v7, %v690_v3  ;;  %v804_v10 = vadd.f32 %v803_v8, %v694_v4  ;;  %v776_v11 = vpop.f32.mrf.mxu0  ;;  %v786_v12 = vpop.f32.mrf.mxu1 }
 0x198   : > { %849 = vst.msk [vmem:[#allocation3 + $0x14] sm:$0xf] %vm843_vm3, %v832_v2  ;;  %v777_v13 = vadd.f32 %v776_v11, %v683_v5  ;;  %v787_v14 = vadd.f32 %v786_v12, %v687_v6 }
 0x199   : > { %v820_v15 = vmax.f32 %v794_v9, 0.0  ;;  %v824_v16 = vmax.f32 %v804_v10, 0.0 }
 0x19a   : > { %v813_v17 = vmax.f32 %v777_v13, 0.0  ;;  %v817_v18 = vmax.f32 %v787_v14, 0.0 }
 0x19b   : > { %v836_v19 = vpack.c.bf16 %v820_v15, %v820_v15  ;;  %v840_v20 = vpack.c.bf16 %v824_v16, %v824_v16 }
 0x19c   : > { %v829_v21 = vpack.c.bf16 %v813_v17, %v813_v17  ;;  %v833_v22 = vpack.c.bf16 %v817_v18, %v817_v18 }
 0x19d   : > { %853 = vst.msk [vmem:[#allocation3 + $0x24] sm:$0xf] %vm843_vm3, %v836_v19 }
 0x19e   : > { %857 = vst.msk [vmem:[#allocation3 + $0x34] sm:$0xf] %vm843_vm3, %v840_v20  ;;  %v796_v27 = vpop.f32.mrf.mxu2  ;;  %v806_v28 = vpop.f32.mrf.mxu3 }
 0x19f   : > { %846 = vst.msk [vmem:[#allocation3 + $0x8] sm:$0xf] %vm843_vm3, %v829_v21  ;;  %v797_v29 = vadd.f32 %v796_v27, %v691_v23  ;;  %v807_v30 = vadd.f32 %v806_v28, %v695_v24  ;;  %v778_v31 = vpop.f32.mrf.mxu0  ;;  %v788_v32 = vpop.f32.mrf.mxu1 }
 0x1a0   : > { %850 = vst.msk [vmem:[#allocation3 + $0x18] sm:$0xf] %vm843_vm3, %v833_v22  ;;  %v779_v33 = vadd.f32 %v778_v31, %v684_v25  ;;  %v789_v34 = vadd.f32 %v788_v32, %v688_v26 }
 0x1a1   : > { %v821_v35 = vmax.f32 %v797_v29, 0.0  ;;  %v825_v36 = vmax.f32 %v807_v30, 0.0 }
 0x1a2   : > { %v814_v37 = vmax.f32 %v779_v33, 0.0  ;;  %v818_v38 = vmax.f32 %v789_v34, 0.0 }
 0x1a3   : > { %v837_v39 = vpack.c.bf16 %v821_v35, %v821_v35  ;;  %v841_v40 = vpack.c.bf16 %v825_v36, %v825_v36 }
 0x1a4   : > { %v830_v41 = vpack.c.bf16 %v814_v37, %v814_v37  ;;  %v834_v42 = vpack.c.bf16 %v818_v38, %v818_v38 }
 0x1a5   : > { %854 = vst.msk [vmem:[#allocation3 + $0x28] sm:$0xf] %vm843_vm3, %v837_v39 }
 0x1a6   : > { %858 = vst.msk [vmem:[#allocation3 + $0x38] sm:$0xf] %vm843_vm3, %v841_v40  ;;  %v798_v45 = vpop.f32.mrf.mxu2  ;;  %v808_v46 = vpop.f32.mrf.mxu3 }
 0x1a7   : > { %847 = vst.msk [vmem:[#allocation3 + $0xc] sm:$0xf] %vm843_vm3, %v830_v41  ;;  %v799_v47 = vadd.f32 %v798_v45, %v692_v43  ;;  %v809_v48 = vadd.f32 %v808_v46, %v696_v44 }
 0x1a8   : > { %851 = vst.msk [vmem:[#allocation3 + $0x1c] sm:$0xf] %vm843_vm3, %v834_v42 }
 0x1a9   : > { %v822_v49 = vmax.f32 %v799_v47, 0.0  ;;  %v826_v50 = vmax.f32 %v809_v48, 0.0 }
 0x1ab   : > { %v838_v51 = vpack.c.bf16 %v822_v49, %v822_v49  ;;  %v842_v52 = vpack.c.bf16 %v826_v50, %v826_v50 }
 0x1ad   : > { %855 = vst.msk [vmem:[#allocation3 + $0x2c] sm:$0xf] %vm843_vm3, %v838_v51 }
 0x1ae   : > { %859 = vst.msk [vmem:[#allocation3 + $0x3c] sm:$0xf] %vm843_vm3, %v842_v52 }
 0x1af PF: > { %p1407_p0 = scmp.lt.s32.totalorder %s1627_s18, 1 }
 0x1b1   : > { %863 = sbr.rel (%p1407_p0) target bundleno = 649 (0x289), region = 56 }
 0x1b6   : > { %v886_v53 = vld [vmem:[%s1724_s28 + $0x30] sm:$0xff]  ;;  %vm987_vm4 = vcmask 1043456   ;;  %v1458_v58 = vld [vmem:[%s1724_s28 + $0x20] sm:$0xf]  ;;  %v1527_v59 = vld [vmem:[%s1724_s28 + $0x24] sm:$0xf0] }
 0x1b7   : > { %v946_v54 = vunpack.c.l.b16 %v886_v53  ;;  %v947_v55 = vunpack.c.h.b16 %v886_v53  ;;  %v1526_v60 = vld [vmem:[%s1724_s28 + $0x24] sm:$0xf]  ;;  %v1460_v61 = vld [vmem:[%s1724_s28 + $0x28] sm:$0xf0]  ;;  %v1459_v0 = vor.u32 %v1527_v59, %v1458_v58  ;;  %v1450_v2 = vld [vmem:[%s1724_s28 + $0x10] sm:$0xf] }
 0x1b8   : > { %v1463_v1 = vor.u32 %v1526_v60, %v1460_v61  ;;  %v1525_v3 = vld [vmem:[%s1724_s28 + $0x14] sm:$0xf0]  ;;  %v1524_v4 = vld [vmem:[%s1724_s28 + $0x14] sm:$0xf]  ;;  %v1452_v5 = vld [vmem:[%s1724_s28 + $0x18] sm:$0xf0] }
 0x1b9   : > { %v954_v56 = vpack.c.b16 %v946_v54, %v946_v54  ;;  %v955_v57 = vpack.c.b16 %v947_v55, %v947_v55  ;;  %v1451_v6 = vor.u32 %v1525_v3, %v1450_v2  ;;  %v1455_v7 = vor.u32 %v1524_v4, %v1452_v5  ;;  %v1442_v8 = vld [vmem:[%s1724_s28] sm:$0xf]  ;;  %v1523_v9 = vld [vmem:[%s1724_s28 + $0x4] sm:$0xf0]  ;;  %v1522_v10 = vld [vmem:[%s1724_s28 + $0x4] sm:$0xf] }
 0x1ba   : > { %v1444_v11 = vld [vmem:[%s1724_s28 + $0x8] sm:$0xf0]  ;;  %v1443_v12 = vor.u32 %v1523_v9, %v1442_v8  ;;  %v1514_v14 = vld [vmem:[#allocation3] sm:$0xff]  ;;  %vm962_vm5 = vcmask 457728   ;;  %v1516_v18 = vld [vmem:[#allocation3 + $0x10] sm:$0xff] }
 0x1bb   : > { %v989_v62 = vsel %vm987_vm4, %v954_v56, 0  ;;  %v992_v63 = vsel %vm987_vm4, %v955_v57, 0  ;;  %v1447_v13 = vor.u32 %v1522_v10, %v1444_v11  ;;  %v1518_v15 = vld [vmem:[#allocation3 + $0x20] sm:$0xff]  ;;  %v1515_v16 = vld [vmem:[#allocation3 + $0x8] sm:$0xff]  ;;  %v1520_v19 = vld [vmem:[#allocation3 + $0x30] sm:$0xff] }
 0x1bc   : > { %998 = vmatpush.bf16.msra.mxu0 %v989_v62  ;;  %1556 = vmatpush.bf16.msra.mxu2 %v989_v62  ;;  %v1519_v17 = vld [vmem:[#allocation3 + $0x28] sm:$0xff]  ;;  %v1517_v20 = vld [vmem:[#allocation3 + $0x18] sm:$0xff] }
 0x1bd   : > { %1047 = vmatpush.bf16.msra.mxu1 %v992_v63  ;;  %1560 = vmatpush.bf16.msra.mxu3 %v992_v63  ;;  %v1521_v21 = vld [vmem:[#allocation3 + $0x38] sm:$0xff] }
 0x1c0   : > { %999 = vmatpush.bf16.msra.mxu0 %v1459_v0  ;;  %1557 = vmatpush.bf16.msra.mxu2 %v1459_v0 }
 0x1c1   : > { %1048 = vmatpush.bf16.msra.mxu1 %v1463_v1  ;;  %1561 = vmatpush.bf16.msra.mxu3 %v1463_v1 }
 0x1c4   : > { %1000 = vmatpush.bf16.msra.mxu0 %v1451_v6  ;;  %1558 = vmatpush.bf16.msra.mxu2 %v1451_v6 }
 0x1c5   : > { %1049 = vmatpush.bf16.msra.mxu1 %v1455_v7  ;;  %1562 = vmatpush.bf16.msra.mxu3 %v1455_v7 }
 0x1c8   : > { %1001 = vmatpush.bf16.msra.mxu0 %v1443_v12  ;;  %1559 = vmatpush.bf16.msra.mxu2 %v1443_v12 }
 0x1c9   : > { %1050 = vmatpush.bf16.msra.mxu1 %v1447_v13  ;;  %1563 = vmatpush.bf16.msra.mxu3 %v1447_v13 }
 0x1cb   : > { %1464 = vmatmul.msk.bf16.vlgmr.msra.gmra.mxu0 %vm962_vm5, %v1514_v14  ;;  %1468 = vmatmul.msk.bf16.vlgmr.msra.gmra.mxu2 %vm962_vm5, %v1518_v15 }
 0x1cc   : > { %1472 = vmatmul.msk.bf16.vlgmr.msra.gmra.mxu1 %vm962_vm5, %v1514_v14  ;;  %1476 = vmatmul.msk.bf16.vlgmr.msra.gmra.mxu3 %vm962_vm5, %v1518_v15 }
 0x1db   : > { %1465 = vmatmul.msk.bf16.gmra.mxu0 %vm962_vm5, %v1515_v16  ;;  %1469 = vmatmul.msk.bf16.gmra.mxu2 %vm962_vm5, %v1519_v17 }
 0x1dc   : > { %1473 = vmatmul.msk.bf16.gmra.mxu1 %vm962_vm5, %v1515_v16  ;;  %1477 = vmatmul.msk.bf16.gmra.mxu3 %vm962_vm5, %v1519_v17 }
 0x1eb   : > { %1466 = vmatmul.msk.bf16.gmra.mxu0 %vm962_vm5, %v1516_v18  ;;  %1470 = vmatmul.msk.bf16.gmra.mxu2 %vm962_vm5, %v1520_v19 }
 0x1ec   : > { %1474 = vmatmul.msk.bf16.gmra.mxu1 %vm962_vm5, %v1516_v18  ;;  %1478 = vmatmul.msk.bf16.gmra.mxu3 %vm962_vm5, %v1520_v19 }
 0x1fb   : > { %1467 = vmatmul.msk.bf16.gmra.mxu0 %vm962_vm5, %v1517_v20  ;;  %1471 = vmatmul.msk.bf16.gmra.mxu2 %vm962_vm5, %v1521_v21 }
 0x1fc   : > { %1475 = vmatmul.msk.bf16.gmra.mxu1 %vm962_vm5, %v1517_v20  ;;  %1479 = vmatmul.msk.bf16.gmra.mxu3 %vm962_vm5, %v1521_v21 }
 0x248   : > { %v1003_v22 = vpop.f32.mrf.mxu0 }
 0x249   : > { %1092 = vst [vmem:[%s1729_s8] sm:$0xff] %v1003_v22  ;;  %v1052_v23 = vpop.f32.mrf.mxu1 }
 0x24a   : > { %1093 = vst [vmem:[%s1729_s8 + $0x8] sm:$0xff] %v1052_v23 }
 0x24e   : > { %v1023_v24 = vpop.f32.mrf.mxu2 }
 0x24f   : > { %1108 = vst [vmem:[%s1729_s8 + $0x80] sm:$0xff] %v1023_v24  ;;  %v1072_v25 = vpop.f32.mrf.mxu3 }
 0x250   : > { %1109 = vst [vmem:[%s1729_s8 + $0x88] sm:$0xff] %v1072_v25  ;;  %v1005_v26 = vpop.f32.mrf.mxu0 }
 0x251   : > { %1094 = vst [vmem:[%s1729_s8 + $0x10] sm:$0xff] %v1005_v26  ;;  %v1054_v27 = vpop.f32.mrf.mxu1 }
 0x252   : > { %1095 = vst [vmem:[%s1729_s8 + $0x18] sm:$0xff] %v1054_v27 }
 0x256   : > { %v1025_v28 = vpop.f32.mrf.mxu2 }
 0x257   : > { %1110 = vst [vmem:[%s1729_s8 + $0x90] sm:$0xff] %v1025_v28  ;;  %v1074_v29 = vpop.f32.mrf.mxu3 }
 0x258   : > { %1111 = vst [vmem:[%s1729_s8 + $0x98] sm:$0xff] %v1074_v29  ;;  %v1008_v30 = vpop.f32.mrf.mxu0 }
 0x259   : > { %1096 = vst [vmem:[%s1729_s8 + $0x20] sm:$0xff] %v1008_v30  ;;  %v1057_v31 = vpop.f32.mrf.mxu1 }
 0x25a   : > { %1097 = vst [vmem:[%s1729_s8 + $0x28] sm:$0xff] %v1057_v31 }
 0x25e   : > { %v1028_v32 = vpop.f32.mrf.mxu2 }
 0x25f   : > { %1112 = vst [vmem:[%s1729_s8 + $0xa0] sm:$0xff] %v1028_v32  ;;  %v1077_v33 = vpop.f32.mrf.mxu3 }
 0x260   : > { %1113 = vst [vmem:[%s1729_s8 + $0xa8] sm:$0xff] %v1077_v33  ;;  %v1010_v34 = vpop.f32.mrf.mxu0 }
 0x261   : > { %1098 = vst [vmem:[%s1729_s8 + $0x30] sm:$0xff] %v1010_v34  ;;  %v1059_v35 = vpop.f32.mrf.mxu1 }
 0x262   : > { %1099 = vst [vmem:[%s1729_s8 + $0x38] sm:$0xff] %v1059_v35 }
 0x266   : > { %v1030_v36 = vpop.f32.mrf.mxu2 }
 0x267   : > { %1114 = vst [vmem:[%s1729_s8 + $0xb0] sm:$0xff] %v1030_v36  ;;  %v1079_v37 = vpop.f32.mrf.mxu3 }
 0x268   : > { %1115 = vst [vmem:[%s1729_s8 + $0xb8] sm:$0xff] %v1079_v37  ;;  %v1013_v38 = vpop.f32.mrf.mxu0 }
 0x269   : > { %1100 = vst [vmem:[%s1729_s8 + $0x40] sm:$0xff] %v1013_v38  ;;  %v1062_v39 = vpop.f32.mrf.mxu1 }
 0x26a   : > { %1101 = vst [vmem:[%s1729_s8 + $0x48] sm:$0xff] %v1062_v39 }
 0x26e   : > { %v1033_v40 = vpop.f32.mrf.mxu2 }
 0x26f   : > { %1116 = vst [vmem:[%s1729_s8 + $0xc0] sm:$0xff] %v1033_v40  ;;  %v1082_v41 = vpop.f32.mrf.mxu3 }
 0x270   : > { %1117 = vst [vmem:[%s1729_s8 + $0xc8] sm:$0xff] %v1082_v41  ;;  %v1015_v42 = vpop.f32.mrf.mxu0 }
 0x271   : > { %1102 = vst [vmem:[%s1729_s8 + $0x50] sm:$0xff] %v1015_v42  ;;  %v1064_v43 = vpop.f32.mrf.mxu1 }
 0x272   : > { %1103 = vst [vmem:[%s1729_s8 + $0x58] sm:$0xff] %v1064_v43 }
 0x276   : > { %v1035_v44 = vpop.f32.mrf.mxu2 }
 0x277   : > { %1118 = vst [vmem:[%s1729_s8 + $0xd0] sm:$0xff] %v1035_v44  ;;  %v1084_v45 = vpop.f32.mrf.mxu3 }
 0x278   : > { %1119 = vst [vmem:[%s1729_s8 + $0xd8] sm:$0xff] %v1084_v45  ;;  %v1018_v46 = vpop.f32.mrf.mxu0 }
 0x279   : > { %1104 = vst [vmem:[%s1729_s8 + $0x60] sm:$0xff] %v1018_v46  ;;  %v1067_v47 = vpop.f32.mrf.mxu1 }
 0x27a   : > { %1105 = vst [vmem:[%s1729_s8 + $0x68] sm:$0xff] %v1067_v47 }
 0x27e   : > { %v1038_v48 = vpop.f32.mrf.mxu2 }
 0x27f   : > { %1120 = vst [vmem:[%s1729_s8 + $0xe0] sm:$0xff] %v1038_v48  ;;  %v1087_v49 = vpop.f32.mrf.mxu3 }
 0x280   : > { %1121 = vst [vmem:[%s1729_s8 + $0xe8] sm:$0xff] %v1087_v49  ;;  %v1020_v50 = vpop.f32.mrf.mxu0 }
 0x281   : > { %1106 = vst [vmem:[%s1729_s8 + $0x70] sm:$0xff] %v1020_v50  ;;  %v1069_v51 = vpop.f32.mrf.mxu1 }
 0x282   : > { %1107 = vst [vmem:[%s1729_s8 + $0x78] sm:$0xff] %v1069_v51 }
 0x286   : > { %v1040_v52 = vpop.f32.mrf.mxu2 }
 0x287   : > { %1122 = vst [vmem:[%s1729_s8 + $0xf0] sm:$0xff] %v1040_v52  ;;  %v1089_v53 = vpop.f32.mrf.mxu3 }
 0x288   : > { %1123 = vst [vmem:[%s1729_s8 + $0xf8] sm:$0xff] %v1089_v53 }
 0x289 PF: > { %s15_s22 = sadd.s32 1, %s1643_s22   ;;  %s1953_s18 = smov %s1635_s20 }
 0x28a   : > { %p12_p1 = scmp.ge.s32.totalorder %s15_s22, 6   ;;  %s1954_s19 = smov %s1639_s21 }
 0x28b   : > { %s1955_s20 = smov %s1958_s23  ;;  %s1956_s21 = smov %s1962_s24 }
 0x28c   :  { %14 = sbr.rel (!%p12_p1) target bundleno = 3 (0x3), region = 92 }

// kernel: ppm_forward.1
= control target key start
LH: loop header
LB: loop body
LE: loop exit
PB: predicated region body
PF: predicated region fallthrough
CT: control target
= control target key end

     0   :  { %s1676_s18 = smov 0   ;;  %s1678_s19 = smov 0   ;;  %s1947_s0 = inlined_call_operand.vmem [shape: bf16[2,64,256], index: 0, kind: input, shape index: {}]   ;;  %s1948_s1 = inlined_call_operand.vmem [shape: bf16[256,56], index: 1, kind: input, shape index: {}]   ;;  %s1949_s2 = inlined_call_operand.vmem [shape: bf16[128,64], index: 2, kind: input, shape index: {}]   ;;  %s1950_s3 = inlined_call_operand.vmem [shape: f32[128,56], index: 3, kind: input, shape index: {}]   ;;  %s1951_s4 = inlined_call_operand.vmem [shape: bf16[56,256], index: 4, kind: input, shape index: {}]   ;;  %s1952_s5 = inlined_call_operand.vmem [shape: f32[2,128,256], index: 5, kind: output, shape index: {}]  }
   0x1   :  { %s1680_s20 = smov 0   ;;  %s1682_s21 = smov 0  }
   0x2   :  { %s1684_s22 = smov 0  }
   0x3 LB: > { %s24_s23 = sadd.s32 1, %s1635_s20  ;;  %s27_s24 = sadd.s32 1, %s1639_s21  ;;  %s1643_s22 = sphi %s1684_s22, %s15_s22   ;;  %s1639_s21 = sphi %s1682_s21, %s1956_s21   ;;  %s1635_s20 = sphi %s1680_s20, %s1955_s20   ;;  %s1631_s19 = sphi %s1678_s19, %s1954_s19   ;;  %s1627_s18 = sphi %s1676_s18, %s1953_s18  }
   0x4   : > { %p25_p0 = scmp.ge.s32.totalorder %s24_s23, 2  ;;  %p1255_p1 = scmp.ge.s32.totalorder %s1643_s22, 1 }
   0x5   : > { %p264_p2 = scmp.lt.s32.totalorder %s1643_s22, 5 }
   0x6   : > { %s1958_s23 = smov (%p25_p0, %s24_s23), 0  ;;  %s1960_s24 = smov (!%p25_p0, %s27_s24), %s1639_s21 }
   0x7   : > { %p265_p3 = pnand %p1255_p1, %p264_p2  ;;  %p29_p4 = scmp.ge.s32.totalorder %s1960_s24, 2 }
   0x8   : > { %p320_p5 = scmp.lt.s32.totalorder (!%p265_p3), %s1627_s18, 0  ;;  %p323_p6 = scmp.lt.s32.totalorder (!%p265_p3), %s1631_s19, 1 }
   0x9   : > { %s1962_s24 = smov (%p29_p4, %s1960_s24), 0  ;;  %268 = sbr.rel (%p265_p3) target bundleno = 649 (0x289), region = 40 }
   0xa   : > { %s1261_s25 = sadd.s32 (!%p265_p3), 4294967295, %s1627_s18  ;;  %p1268_p11 = scmp.ne.s32.totalorder (!%p265_p3), %s1627_s18, 0 }
   0xb   : > { %p345_p9 = scmp.gt.s32.totalorder (!%p265_p3), %s1261_s25, 0 }
   0xe   : > { %s321_s26 = scalar_select %p320_p5, %s1627_s18, 0 }
   0xf   : > { %s1964_s19 = smov (!%p323_p6, %s1631_s19), 1  ;;  %s1970_s25 = smov (!%p345_p9, %s1261_s25), 0 }
  0x10   : > { %s1256_s27 = sshll.u32 %s321_s26, 1  ;;  %s1259_s28 = sshll.u32 %s321_s26, 5 }
  0x11   : > { %p325_p7 = scmp.lt.s32.totalorder %s1256_s27, 1  ;;  %s1257_s29 = sshll.u32 %s1964_s19, 4 }
  0x12   : > { %p337_p8 = scmp.lt.s32.totalorder %s1259_s28, 31  ;;  %s1262_s14 = sshll.u32 %s1970_s25, 1 }
  0x13   : > { %s1966_s27 = smov (!%p325_p7, %s1256_s27), 1  ;;  %p348_p10 = scmp.lt.s32.totalorder %s1262_s14, 1 }
  0x14   : > { %s1968_s28 = smov (!%p337_p8, %s1259_s28), 31  ;;  %s328_s30 = sadd.s32 %s1257_s29, %s1966_s27 }
  0x15   : > { %s1258_s6 = sshll.u32 %s328_s30, 2  ;;  %s1260_s7 = sshll.u32 %s1968_s28, 2 }
  0x16   : > { %s1714_s10 = scalar_lea.vmem %s1947_s0, %s1258_s6  ;;  %s1719_s13 = scalar_lea.vmem %s1948_s1, %s1260_s7 }
  0x17   : > { %s1266_s15 = sshll.u32 %s1964_s19, 5  ;;  %s1972_s14 = smov (!%p348_p10, %s1262_s14), 1 }
  0x18   : > { %s1263_s16 = sshll.u32 %s1972_s14, 2  ;;  %s365_s17 = sadd.s32 %s1266_s15, %s1972_s14 }
  0x19   : > { %s1724_s28 = scalar_lea.vmem %s1951_s4, %s1263_s16  ;;  %s1267_s29 = sshll.u32 %s365_s17, 3 }
  0x1a   : > { %s1729_s8 = scalar_lea.vmem %s1952_s5, %s1267_s29  ;;  %376 = sbr.rel (%p1268_p11) target bundleno = 40 (0x28), region = 44 }
  0x1f   : > { %vm377_vm0 = vcmask 457728   ;;  %v1645_v0 = vmov 0.0  }
  0x20   : > { %378 = vst.msk [vmem:[#allocation2] sm:$0xff] %vm377_vm0, %v1645_v0 }
  0x21   : > { %379 = vst.msk [vmem:[#allocation2 + $0x8] sm:$0xff] %vm377_vm0, %v1645_v0 }
  0x22   : > { %380 = vst.msk [vmem:[#allocation2 + $0x10] sm:$0xff] %vm377_vm0, %v1645_v0 }
  0x23   : > { %381 = vst.msk [vmem:[#allocation2 + $0x18] sm:$0xff] %vm377_vm0, %v1645_v0 }
  0x24   : > { %382 = vst.msk [vmem:[#allocation2 + $0x20] sm:$0xff] %vm377_vm0, %v1645_v0 }
  0x25   : > { %383 = vst.msk [vmem:[#allocation2 + $0x28] sm:$0xff] %vm377_vm0, %v1645_v0 }
  0x26   : > { %384 = vst.msk [vmem:[#allocation2 + $0x30] sm:$0xff] %vm377_vm0, %v1645_v0 }
  0x27   : > { %385 = vst.msk [vmem:[#allocation2 + $0x38] sm:$0xff] %vm377_vm0, %v1645_v0 }
  0x28 PF: > { %p1269_p12 = scmp.ge.s32.totalorder %s1627_s18, 1 }
  0x2a   : > { %389 = sbr.rel (%p1269_p12) target bundleno = 241 (0xf1), region = 48 }
  0x2f   : > { %v1497_v1 = vld [vmem:[%s1719_s13 + $0x38] sm:$0xff]  ;;  %v1496_v3 = vld [vmem:[%s1719_s13 + $0x30] sm:$0xff]  ;;  %v1495_v5 = vld [vmem:[%s1719_s13 + $0x28] sm:$0xff]  ;;  %vm640_vm1 = vcmask 457728  }
  0x30   : > { %v1505_v2 = vld [vmem:[%s1719_s13 + $0x78] sm:$0xff]  ;;  %574 = vmatpush.bf16.msra.mxu0 %v1497_v1  ;;  %1528 = vmatpush.bf16.msra.mxu2 %v1497_v1  ;;  %v1504_v4 = vld [vmem:[%s1719_s13 + $0x70] sm:$0xff]  ;;  %v1503_v6 = vld [vmem:[%s1719_s13 + $0x68] sm:$0xff] }
  0x31   : > { %603 = vmatpush.bf16.msra.mxu1 %v1505_v2  ;;  %1536 = vmatpush.bf16.msra.mxu3 %v1505_v2  ;;  %v1494_v7 = vld [vmem:[%s1719_s13 + $0x20] sm:$0xff]  ;;  %v1493_v9 = vld [vmem:[%s1719_s13 + $0x18] sm:$0xff]  ;;  %v1492_v11 = vld [vmem:[%s1719_s13 + $0x10] sm:$0xff] }
  0x32   : > { %v1502_v8 = vld [vmem:[%s1719_s13 + $0x60] sm:$0xff]  ;;  %v1501_v10 = vld [vmem:[%s1719_s13 + $0x58] sm:$0xff]  ;;  %v1500_v12 = vld [vmem:[%s1719_s13 + $0x50] sm:$0xff] }
  0x33   : > { %v1491_v13 = vld [vmem:[%s1719_s13 + $0x8] sm:$0xff]  ;;  %v1490_v15 = vld [vmem:[%s1719_s13] sm:$0xff]  ;;  %v1280_v29 = vld [vmem:[%s1714_s10 + $0x10] sm:$0xf] }
  0x34   : > { %575 = vmatpush.bf16.msra.mxu0 %v1496_v3  ;;  %1529 = vmatpush.bf16.msra.mxu2 %v1496_v3  ;;  %v1499_v14 = vld [vmem:[%s1719_s13 + $0x48] sm:$0xff]  ;;  %v1498_v16 = vld [vmem:[%s1719_s13 + $0x40] sm:$0xff]  ;;  %v1485_v30 = vld [vmem:[%s1714_s10 + $0x14] sm:$0xf0] }
  0x35   : > { %604 = vmatpush.bf16.msra.mxu1 %v1504_v4  ;;  %1537 = vmatpush.bf16.msra.mxu3 %v1504_v4  ;;  %v1272_v17 = vld [vmem:[%s1714_s10] sm:$0xf]  ;;  %v1483_v18 = vld [vmem:[%s1714_s10 + $0x4] sm:$0xf0]  ;;  %v1482_v21 = vld [vmem:[%s1714_s10 + $0x4] sm:$0xf]  ;;  %v1281_v37 = vor.u32 %v1485_v30, %v1280_v29 }
  0x36   : > { %v1288_v19 = vld [vmem:[%s1714_s10 + $0x20] sm:$0xf]  ;;  %v1487_v20 = vld [vmem:[%s1714_s10 + $0x24] sm:$0xf0]  ;;  %v1274_v22 = vld [vmem:[%s1714_s10 + $0x8] sm:$0xf0]  ;;  %v1273_v25 = vor.u32 %v1483_v18, %v1272_v17 }
  0x37   : > { %v1486_v23 = vld [vmem:[%s1714_s10 + $0x24] sm:$0xf]  ;;  %v1290_v24 = vld [vmem:[%s1714_s10 + $0x28] sm:$0xf0]  ;;  %v1289_v26 = vor.u32 %v1487_v20, %v1288_v19  ;;  %v1277_v27 = vor.u32 %v1482_v21, %v1274_v22  ;;  %v1296_v31 = vld [vmem:[%s1714_s10 + $0x30] sm:$0xf] }
  0x38   : > { %576 = vmatpush.bf16.msra.mxu0 %v1495_v5  ;;  %1530 = vmatpush.bf16.msra.mxu2 %v1495_v5  ;;  %v1293_v28 = vor.u32 %v1486_v23, %v1290_v24  ;;  %v1489_v32 = vld [vmem:[%s1714_s10 + $0x34] sm:$0xf0]  ;;  %v1484_v33 = vld [vmem:[%s1714_s10 + $0x14] sm:$0xf]  ;;  %v1282_v34 = vld [vmem:[%s1714_s10 + $0x18] sm:$0xf0] }
  0x39   : > { %605 = vmatpush.bf16.msra.mxu1 %v1503_v6  ;;  %1538 = vmatpush.bf16.msra.mxu3 %v1503_v6  ;;  %v1488_v35 = vld [vmem:[%s1714_s10 + $0x34] sm:$0xf]  ;;  %v1298_v36 = vld [vmem:[%s1714_s10 + $0x38] sm:$0xf0]  ;;  %v1297_v38 = vor.u32 %v1489_v32, %v1296_v31  ;;  %v1285_v39 = vor.u32 %v1484_v33, %v1282_v34  ;;  %v390_v42 = vld [vmem:[#allocation2] sm:$0xff] }
  0x3a   : > { %v1301_v40 = vor.u32 %v1488_v35, %v1298_v36  ;;  %v394_v47 = vld [vmem:[#allocation2 + $0x20] sm:$0xff]  ;;  %v391_v51 = vld [vmem:[#allocation2 + $0x8] sm:$0xff]  ;;  %v392_v61 = vld [vmem:[#allocation2 + $0x10] sm:$0xff] }
  0x3b   : > { %v395_v57 = vld [vmem:[#allocation2 + $0x28] sm:$0xff]  ;;  %v396_v3 = vld [vmem:[#allocation2 + $0x30] sm:$0xff] }
  0x3c   : > { %577 = vmatpush.bf16.msra.mxu0 %v1494_v7  ;;  %1531 = vmatpush.bf16.msra.mxu2 %v1494_v7  ;;  %v393_v7 = vld [vmem:[#allocation2 + $0x18] sm:$0xff] }
  0x3d   : > { %606 = vmatpush.bf16.msra.mxu1 %v1502_v8  ;;  %1539 = vmatpush.bf16.msra.mxu3 %v1502_v8 }
  0x40   : > { %578 = vmatpush.bf16.msra.mxu0 %v1493_v9  ;;  %1532 = vmatpush.bf16.msra.mxu2 %v1493_v9 }
  0x41   : > { %607 = vmatpush.bf16.msra.mxu1 %v1501_v10  ;;  %1540 = vmatpush.bf16.msra.mxu3 %v1501_v10 }
  0x44   : > { %579 = vmatpush.bf16.msra.mxu0 %v1492_v11  ;;  %1533 = vmatpush.bf16.msra.mxu2 %v1492_v11 }
  0x45   : > { %608 = vmatpush.bf16.msra.mxu1 %v1500_v12  ;;  %1541 = vmatpush.bf16.msra.mxu3 %v1500_v12 }
  0x48   : > { %580 = vmatpush.bf16.msra.mxu0 %v1491_v13  ;;  %1534 = vmatpush.bf16.msra.mxu2 %v1491_v13  ;;  %v397_v13 = vld [vmem:[#allocation2 + $0x38] sm:$0xff] }
  0x49   : > { %609 = vmatpush.bf16.msra.mxu1 %v1499_v14  ;;  %1542 = vmatpush.bf16.msra.mxu3 %v1499_v14 }
  0x4c   : > { %581 = vmatpush.bf16.msra.mxu0 %v1490_v15  ;;  %1535 = vmatpush.bf16.msra.mxu2 %v1490_v15 }
  0x4d   : > { %610 = vmatpush.bf16.msra.mxu1 %v1498_v16  ;;  %1543 = vmatpush.bf16.msra.mxu3 %v1498_v16 }
  0x4f   : > { %582 = vmatmul.bf16.vlgmr.msra.gmra.mxu0 %v1273_v25  ;;  %592 = vmatmul.bf16.vlgmr.msra.gmra.mxu2 %v1289_v26 }
  0x50   : > { %611 = vmatmul.bf16.vlgmr.msra.gmra.mxu1 %v1277_v27  ;;  %621 = vmatmul.bf16.vlgmr.msra.gmra.mxu3 %v1293_v28 }
  0x5f   : > { %587 = vmatmul.bf16.gmra.mxu0 %v1281_v37  ;;  %597 = vmatmul.bf16.gmra.mxu2 %v1297_v38 }
  0x60   : > { %616 = vmatmul.bf16.gmra.mxu1 %v1285_v39  ;;  %626 = vmatmul.bf16.gmra.mxu3 %v1301_v40 }
  0xcc   : > { %v583_v41 = vpop.f32.mrf.mxu0 }
  0xcd   : > { %v612_v43 = vpop.f32.mrf.mxu1 }
  0xce   : > { %v613_v44 = vadd.f32 %v612_v43, %v583_v41 }
  0xd0   : > { %v632_v45 = vadd.f32 %v613_v44, %v390_v42 }
  0xd2   : > { %641 = vst.msk [vmem:[#allocation2] sm:$0xff] %vm640_vm1, %v632_v45  ;;  %v593_v46 = vpop.f32.mrf.mxu2 }
  0xd3   : > { %v622_v48 = vpop.f32.mrf.mxu3 }
  0xd4   : > { %v623_v49 = vadd.f32 %v622_v48, %v593_v46  ;;  %v585_v50 = vpop.f32.mrf.mxu0 }
  0xd5   : > { %v614_v52 = vpop.f32.mrf.mxu1 }
  0xd6   : > { %v636_v53 = vadd.f32 %v623_v49, %v394_v47  ;;  %v615_v54 = vadd.f32 %v614_v52, %v585_v50 }
  0xd8   : > { %645 = vst.msk [vmem:[#allocation2 + $0x20] sm:$0xff] %vm640_vm1, %v636_v53  ;;  %v633_v55 = vadd.f32 %v615_v54, %v391_v51 }
  0xda   : > { %642 = vst.msk [vmem:[#allocation2 + $0x8] sm:$0xff] %vm640_vm1, %v633_v55  ;;  %v595_v56 = vpop.f32.mrf.mxu2 }
  0xdb   : > { %v624_v58 = vpop.f32.mrf.mxu3 }
  0xdc   : > { %v625_v59 = vadd.f32 %v624_v58, %v595_v56  ;;  %v588_v60 = vpop.f32.mrf.mxu0 }
  0xdd   : > { %v617_v62 = vpop.f32.mrf.mxu1 }
  0xde   : > { %v637_v63 = vadd.f32 %v625_v59, %v395_v57  ;;  %v618_v0 = vadd.f32 %v617_v62, %v588_v60 }
  0xe0   : > { %646 = vst.msk [vmem:[#allocation2 + $0x28] sm:$0xff] %vm640_vm1, %v637_v63  ;;  %v634_v1 = vadd.f32 %v618_v0, %v392_v61 }
  0xe2   : > { %643 = vst.msk [vmem:[#allocation2 + $0x10] sm:$0xff] %vm640_vm1, %v634_v1  ;;  %v598_v2 = vpop.f32.mrf.mxu2 }
  0xe3   : > { %v627_v4 = vpop.f32.mrf.mxu3 }
  0xe4   : > { %v628_v5 = vadd.f32 %v627_v4, %v598_v2  ;;  %v590_v6 = vpop.f32.mrf.mxu0 }
  0xe5   : > { %v619_v8 = vpop.f32.mrf.mxu1 }
  0xe6   : > { %v638_v9 = vadd.f32 %v628_v5, %v396_v3  ;;  %v620_v10 = vadd.f32 %v619_v8, %v590_v6 }
  0xe8   : > { %647 = vst.msk [vmem:[#allocation2 + $0x30] sm:$0xff] %vm640_vm1, %v638_v9  ;;  %v635_v11 = vadd.f32 %v620_v10, %v393_v7 }
  0xea   : > { %644 = vst.msk [vmem:[#allocation2 + $0x18] sm:$0xff] %vm640_vm1, %v635_v11  ;;  %v600_v12 = vpop.f32.mrf.mxu2 }
  0xeb   : > { %v629_v14 = vpop.f32.mrf.mxu3 }
  0xec   : > { %v630_v15 = vadd.f32 %v629_v14, %v600_v12 }
  0xee   : > { %v639_v16 = vadd.f32 %v630_v15, %v397_v13 }
  0xf0   : > { %648 = vst.msk [vmem:[#allocation2 + $0x38] sm:$0xff] %vm640_vm1, %v639_v16 }
  0xf1 PF: > { %p1366_p13 = scmp.ne.s32.totalorder %s1627_s18, 1 }
  0xf3   : > { %652 = sbr.rel (%p1366_p13) target bundleno = 431 (0x1af), region = 52 }
  0xf8   : > { %v675_v17 = vld [vmem:[#allocation2 + $0x30] sm:$0xff]  ;;  %v676_v18 = vld [vmem:[#allocation2 + $0x38] sm:$0xff]  ;;  %v673_v19 = vld [vmem:[#allocation2 + $0x20] sm:$0xff]  ;;  %vm737_vm2 = vcmask 523264   ;;  %vm843_vm3 = vcmask 453632  }
  0xf9   : > { %v680_v20 = vpack.c.bf16 %v676_v18, %v675_v17  ;;  %v674_v21 = vld [vmem:[#allocation2 + $0x28] sm:$0xff]  ;;  %v671_v23 = vld [vmem:[#allocation2 + $0x10] sm:$0xff]  ;;  %v672_v24 = vld [vmem:[#allocation2 + $0x18] sm:$0xff] }
  0xfa   : > { %v679_v22 = vpack.c.bf16 %v674_v21, %v673_v19  ;;  %v678_v25 = vpack.c.bf16 %v672_v24, %v671_v23  ;;  %v669_v26 = vld [vmem:[#allocation2] sm:$0xff]  ;;  %v670_v27 = vld [vmem:[#allocation2 + $0x8] sm:$0xff]  ;;  %v1508_v30 = vld [vmem:[%s1949_s2 + $0x10] sm:$0xff] }
  0xfb   : > { %766 = vmatpush.bf16.msra.mxu0 %v680_v20  ;;  %1544 = vmatpush.bf16.msra.mxu1 %v680_v20  ;;  %v677_v28 = vpack.c.bf16 %v670_v27, %v669_v26  ;;  %v1506_v29 = vld [vmem:[%s1949_s2] sm:$0xff]  ;;  %v1512_v32 = vld [vmem:[%s1949_s2 + $0x30] sm:$0xff]  ;;  %v1507_v33 = vld [vmem:[%s1949_s2 + $0x8] sm:$0xff] }
  0xfc   : > { %1545 = vmatpush.bf16.msra.mxu2 %v680_v20  ;;  %1546 = vmatpush.bf16.msra.mxu3 %v680_v20  ;;  %v1510_v31 = vld [vmem:[%s1949_s2 + $0x20] sm:$0xff]  ;;  %v1509_v34 = vld [vmem:[%s1949_s2 + $0x18] sm:$0xff]  ;;  %v1511_v35 = vld [vmem:[%s1949_s2 + $0x28] sm:$0xff] }
  0xfd   : > { %v1513_v36 = vld [vmem:[%s1949_s2 + $0x38] sm:$0xff]  ;;  %v681_v37 = vld [vmem:[%s1950_s3] sm:$0xff]  ;;  %v682_v49 = vld [vmem:[%s1950_s3 + $0x8] sm:$0xff] }
  0xfe   : > { %v685_v38 = vld [vmem:[%s1950_s3 + $0x20] sm:$0xff]  ;;  %v686_v50 = vld [vmem:[%s1950_s3 + $0x28] sm:$0xff]  ;;  %v683_v5 = vld [vmem:[%s1950_s3 + $0x10] sm:$0xff] }
  0xff   : > { %767 = vmatpush.bf16.msra.mxu0 %v679_v22  ;;  %1547 = vmatpush.bf16.msra.mxu1 %v679_v22  ;;  %v689_v47 = vld [vmem:[%s1950_s3 + $0x40] sm:$0xff]  ;;  %v690_v3 = vld [vmem:[%s1950_s3 + $0x48] sm:$0xff]  ;;  %v687_v6 = vld [vmem:[%s1950_s3 + $0x30] sm:$0xff] }
 0x100   : > { %1548 = vmatpush.bf16.msra.mxu2 %v679_v22  ;;  %1549 = vmatpush.bf16.msra.mxu3 %v679_v22  ;;  %v693_v48 = vld [vmem:[%s1950_s3 + $0x60] sm:$0xff]  ;;  %v694_v4 = vld [vmem:[%s1950_s3 + $0x68] sm:$0xff]  ;;  %v691_v23 = vld [vmem:[%s1950_s3 + $0x50] sm:$0xff] }
 0x101   : > { %v695_v24 = vld [vmem:[%s1950_s3 + $0x70] sm:$0xff]  ;;  %v688_v26 = vld [vmem:[%s1950_s3 + $0x38] sm:$0xff] }
 0x103   : > { %768 = vmatpush.bf16.msra.mxu0 %v678_v25  ;;  %1550 = vmatpush.bf16.msra.mxu1 %v678_v25 }
 0x104   : > { %1551 = vmatpush.bf16.msra.mxu2 %v678_v25  ;;  %1552 = vmatpush.bf16.msra.mxu3 %v678_v25  ;;  %v684_v25 = vld [vmem:[%s1950_s3 + $0x18] sm:$0xff] }
 0x107   : > { %769 = vmatpush.bf16.msra.mxu0 %v677_v28  ;;  %1553 = vmatpush.bf16.msra.mxu1 %v677_v28 }
 0x108   : > { %1554 = vmatpush.bf16.msra.mxu2 %v677_v28  ;;  %1555 = vmatpush.bf16.msra.mxu3 %v677_v28 }
 0x10a   : > { %1399 = vmatmul.msk.bf16.vlgmr.msra.gmra.mxu0 %vm737_vm2, %v1506_v29  ;;  %1401 = vmatmul.msk.bf16.vlgmr.msra.gmra.mxu1 %vm737_vm2, %v1508_v30 }
 0x10b   : > { %1403 = vmatmul.msk.bf16.vlgmr.msra.gmra.mxu2 %vm737_vm2, %v1510_v31  ;;  %1405 = vmatmul.msk.bf16.vlgmr.msra.gmra.mxu3 %vm737_vm2, %v1512_v32 }
 0x11a   : > { %1400 = vmatmul.msk.bf16.gmra.mxu0 %vm737_vm2, %v1507_v33  ;;  %1402 = vmatmul.msk.bf16.gmra.mxu1 %vm737_vm2, %v1509_v34 }
 0x11b   : > { %1404 = vmatmul.msk.bf16.gmra.mxu2 %vm737_vm2, %v1511_v35  ;;  %1406 = vmatmul.msk.bf16.gmra.mxu3 %vm737_vm2, %v1513_v36 }
 0x187   : > { %v771_v39 = vpop.f32.mrf.mxu0  ;;  %v781_v40 = vpop.f32.mrf.mxu1 }
 0x188   : > { %v772_v41 = vadd.f32 %v771_v39, %v681_v37  ;;  %v782_v42 = vadd.f32 %v781_v40, %v685_v38 }
 0x18a   : > { %v811_v43 = vmax.f32 %v772_v41, 0.0  ;;  %v815_v44 = vmax.f32 %v782_v42, 0.0 }
 0x18c   : > { %v827_v45 = vpack.c.bf16 %v811_v43, %v811_v43  ;;  %v831_v46 = vpack.c.bf16 %v815_v44, %v815_v44  ;;  %v692_v43 = vld [vmem:[%s1950_s3 + $0x58] sm:$0xff] }
 0x18d   : > { %v696_v44 = vld [vmem:[%s1950_s3 + $0x78] sm:$0xff] }
 0x18e   : > { %844 = vst.msk [vmem:[#allocation3] sm:$0xf] %vm843_vm3, %v827_v45  ;;  %v791_v51 = vpop.f32.mrf.mxu2  ;;  %v801_v52 = vpop.f32.mrf.mxu3 }
 0x18f   : > { %848 = vst.msk [vmem:[#allocation3 + $0x10] sm:$0xf] %vm843_vm3, %v831_v46  ;;  %v792_v53 = vadd.f32 %v791_v51, %v689_v47  ;;  %v802_v54 = vadd.f32 %v801_v52, %v693_v48  ;;  %v773_v55 = vpop.f32.mrf.mxu0  ;;  %v783_v56 = vpop.f32.mrf.mxu1 }
 0x190   : > { %v774_v57 = vadd.f32 %v773_v55, %v682_v49  ;;  %v784_v58 = vadd.f32 %v783_v56, %v686_v50 }
 0x191   : > { %v819_v59 = vmax.f32 %v792_v53, 0.0  ;;  %v823_v60 = vmax.f32 %v802_v54, 0.0 }
 0x192   : > { %v812_v61 = vmax.f32 %v774_v57, 0.0  ;;  %v816_v62 = vmax.f32 %v784_v58, 0.0 }
 0x193   : > { %v835_v63 = vpack.c.bf16 %v819_v59, %v819_v59  ;;  %v839_v0 = vpack.c.bf16 %v823_v60, %v823_v60 }
 0x194   : > { %v828_v1 = vpack.c.bf16 %v812_v61, %v812_v61  ;;  %v832_v2 = vpack.c.bf16 %v816_v62, %v816_v62 }
 0x195   : > { %852 = vst.msk [vmem:[#allocation3 + $0x20] sm:$0xf] %vm843_vm3, %v835_v63 }
 0x196   : > { %856 = vst.msk [vmem:[#allocation3 + $0x30] sm:$0xf] %vm843_vm3, %v839_v0  ;;  %v793_v7 = vpop.f32.mrf.mxu2  ;;  %v803_v8 = vpop.f32.mrf.mxu3 }
 0x197   : > { %845 = vst.msk [vmem:[#allocation3 + $0x4] sm:$0xf] %vm843_vm3, %v828_v1  ;;  %v794_v9 = vadd.f32 %v793_v7, %v690_v3  ;;  %v804_v10 = vadd.f32 %v803_v8, %v694_v4  ;;  %v776_v11 = vpop.f32.mrf.mxu0  ;;  %v786_v12 = vpop.f32.mrf.mxu1 }
 0x198   : > { %849 = vst.msk [vmem:[#allocation3 + $0x14] sm:$0xf] %vm843_vm3, %v832_v2  ;;  %v777_v13 = vadd.f32 %v776_v11, %v683_v5  ;;  %v787_v14 = vadd.f32 %v786_v12, %v687_v6 }
 0x199   : > { %v820_v15 = vmax.f32 %v794_v9, 0.0  ;;  %v824_v16 = vmax.f32 %v804_v10, 0.0 }
 0x19a   : > { %v813_v17 = vmax.f32 %v777_v13, 0.0  ;;  %v817_v18 = vmax.f32 %v787_v14, 0.0 }
 0x19b   : > { %v836_v19 = vpack.c.bf16 %v820_v15, %v820_v15  ;;  %v840_v20 = vpack.c.bf16 %v824_v16, %v824_v16 }
 0x19c   : > { %v829_v21 = vpack.c.bf16 %v813_v17, %v813_v17  ;;  %v833_v22 = vpack.c.bf16 %v817_v18, %v817_v18 }
 0x19d   : > { %853 = vst.msk [vmem:[#allocation3 + $0x24] sm:$0xf] %vm843_vm3, %v836_v19 }
 0x19e   : > { %857 = vst.msk [vmem:[#allocation3 + $0x34] sm:$0xf] %vm843_vm3, %v840_v20  ;;  %v796_v27 = vpop.f32.mrf.mxu2  ;;  %v806_v28 = vpop.f32.mrf.mxu3 }
 0x19f   : > { %846 = vst.msk [vmem:[#allocation3 + $0x8] sm:$0xf] %vm843_vm3, %v829_v21  ;;  %v797_v29 = vadd.f32 %v796_v27, %v691_v23  ;;  %v807_v30 = vadd.f32 %v806_v28, %v695_v24  ;;  %v778_v31 = vpop.f32.mrf.mxu0  ;;  %v788_v32 = vpop.f32.mrf.mxu1 }
 0x1a0   : > { %850 = vst.msk [vmem:[#allocation3 + $0x18] sm:$0xf] %vm843_vm3, %v833_v22  ;;  %v779_v33 = vadd.f32 %v778_v31, %v684_v25  ;;  %v789_v34 = vadd.f32 %v788_v32, %v688_v26 }
 0x1a1   : > { %v821_v35 = vmax.f32 %v797_v29, 0.0  ;;  %v825_v36 = vmax.f32 %v807_v30, 0.0 }
 0x1a2   : > { %v814_v37 = vmax.f32 %v779_v33, 0.0  ;;  %v818_v38 = vmax.f32 %v789_v34, 0.0 }
 0x1a3   : > { %v837_v39 = vpack.c.bf16 %v821_v35, %v821_v35  ;;  %v841_v40 = vpack.c.bf16 %v825_v36, %v825_v36 }
 0x1a4   : > { %v830_v41 = vpack.c.bf16 %v814_v37, %v814_v37  ;;  %v834_v42 = vpack.c.bf16 %v818_v38, %v818_v38 }
 0x1a5   : > { %854 = vst.msk [vmem:[#allocation3 + $0x28] sm:$0xf] %vm843_vm3, %v837_v39 }
 0x1a6   : > { %858 = vst.msk [vmem:[#allocation3 + $0x38] sm:$0xf] %vm843_vm3, %v841_v40  ;;  %v798_v45 = vpop.f32.mrf.mxu2  ;;  %v808_v46 = vpop.f32.mrf.mxu3 }
 0x1a7   : > { %847 = vst.msk [vmem:[#allocation3 + $0xc] sm:$0xf] %vm843_vm3, %v830_v41  ;;  %v799_v47 = vadd.f32 %v798_v45, %v692_v43  ;;  %v809_v48 = vadd.f32 %v808_v46, %v696_v44 }
 0x1a8   : > { %851 = vst.msk [vmem:[#allocation3 + $0x1c] sm:$0xf] %vm843_vm3, %v834_v42 }
 0x1a9   : > { %v822_v49 = vmax.f32 %v799_v47, 0.0  ;;  %v826_v50 = vmax.f32 %v809_v48, 0.0 }
 0x1ab   : > { %v838_v51 = vpack.c.bf16 %v822_v49, %v822_v49  ;;  %v842_v52 = vpack.c.bf16 %v826_v50, %v826_v50 }
 0x1ad   : > { %855 = vst.msk [vmem:[#allocation3 + $0x2c] sm:$0xf] %vm843_vm3, %v838_v51 }
 0x1ae   : > { %859 = vst.msk [vmem:[#allocation3 + $0x3c] sm:$0xf] %vm843_vm3, %v842_v52 }
 0x1af PF: > { %p1407_p0 = scmp.lt.s32.totalorder %s1627_s18, 1 }
 0x1b1   : > { %863 = sbr.rel (%p1407_p0) target bundleno = 649 (0x289), region = 56 }
 0x1b6   : > { %v886_v53 = vld [vmem:[%s1724_s28 + $0x30] sm:$0xff]  ;;  %vm987_vm4 = vcmask 1043456   ;;  %v1458_v58 = vld [vmem:[%s1724_s28 + $0x20] sm:$0xf]  ;;  %v1527_v59 = vld [vmem:[%s1724_s28 + $0x24] sm:$0xf0] }
 0x1b7   : > { %v946_v54 = vunpack.c.l.b16 %v886_v53  ;;  %v947_v55 = vunpack.c.h.b16 %v886_v53  ;;  %v1526_v60 = vld [vmem:[%s1724_s28 + $0x24] sm:$0xf]  ;;  %v1460_v61 = vld [vmem:[%s1724_s28 + $0x28] sm:$0xf0]  ;;  %v1459_v0 = vor.u32 %v1527_v59, %v1458_v58  ;;  %v1450_v2 = vld [vmem:[%s1724_s28 + $0x10] sm:$0xf] }
 0x1b8   : > { %v1463_v1 = vor.u32 %v1526_v60, %v1460_v61  ;;  %v1525_v3 = vld [vmem:[%s1724_s28 + $0x14] sm:$0xf0]  ;;  %v1524_v4 = vld [vmem:[%s1724_s28 + $0x14] sm:$0xf]  ;;  %v1452_v5 = vld [vmem:[%s1724_s28 + $0x18] sm:$0xf0] }
 0x1b9   : > { %v954_v56 = vpack.c.b16 %v946_v54, %v946_v54  ;;  %v955_v57 = vpack.c.b16 %v947_v55, %v947_v55  ;;  %v1451_v6 = vor.u32 %v1525_v3, %v1450_v2  ;;  %v1455_v7 = vor.u32 %v1524_v4, %v1452_v5  ;;  %v1442_v8 = vld [vmem:[%s1724_s28] sm:$0xf]  ;;  %v1523_v9 = vld [vmem:[%s1724_s28 + $0x4] sm:$0xf0]  ;;  %v1522_v10 = vld [vmem:[%s1724_s28 + $0x4] sm:$0xf] }
 0x1ba   : > { %v1444_v11 = vld [vmem:[%s1724_s28 + $0x8] sm:$0xf0]  ;;  %v1443_v12 = vor.u32 %v1523_v9, %v1442_v8  ;;  %v1514_v14 = vld [vmem:[#allocation3] sm:$0xff]  ;;  %vm962_vm5 = vcmask 457728   ;;  %v1516_v18 = vld [vmem:[#allocation3 + $0x10] sm:$0xff] }
 0x1bb   : > { %v989_v62 = vsel %vm987_vm4, %v954_v56, 0  ;;  %v992_v63 = vsel %vm987_vm4, %v955_v57, 0  ;;  %v1447_v13 = vor.u32 %v1522_v10, %v1444_v11  ;;  %v1518_v15 = vld [vmem:[#allocation3 + $0x20] sm:$0xff]  ;;  %v1515_v16 = vld [vmem:[#allocation3 + $0x8] sm:$0xff]  ;;  %v1520_v19 = vld [vmem:[#allocation3 + $0x30] sm:$0xff] }
 0x1bc   : > { %998 = vmatpush.bf16.msra.mxu0 %v989_v62  ;;  %1556 = vmatpush.bf16.msra.mxu2 %v989_v62  ;;  %v1519_v17 = vld [vmem:[#allocation3 + $0x28] sm:$0xff]  ;;  %v1517_v20 = vld [vmem:[#allocation3 + $0x18] sm:$0xff] }
 0x1bd   : > { %1047 = vmatpush.bf16.msra.mxu1 %v992_v63  ;;  %1560 = vmatpush.bf16.msra.mxu3 %v992_v63  ;;  %v1521_v21 = vld [vmem:[#allocation3 + $0x38] sm:$0xff] }
 0x1c0   : > { %999 = vmatpush.bf16.msra.mxu0 %v1459_v0  ;;  %1557 = vmatpush.bf16.msra.mxu2 %v1459_v0 }
 0x1c1   : > { %1048 = vmatpush.bf16.msra.mxu1 %v1463_v1  ;;  %1561 = vmatpush.bf16.msra.mxu3 %v1463_v1 }
 0x1c4   : > { %1000 = vmatpush.bf16.msra.mxu0 %v1451_v6  ;;  %1558 = vmatpush.bf16.msra.mxu2 %v1451_v6 }
 0x1c5   : > { %1049 = vmatpush.bf16.msra.mxu1 %v1455_v7  ;;  %1562 = vmatpush.bf16.msra.mxu3 %v1455_v7 }
 0x1c8   : > { %1001 = vmatpush.bf16.msra.mxu0 %v1443_v12  ;;  %1559 = vmatpush.bf16.msra.mxu2 %v1443_v12 }
 0x1c9   : > { %1050 = vmatpush.bf16.msra.mxu1 %v1447_v13  ;;  %1563 = vmatpush.bf16.msra.mxu3 %v1447_v13 }
 0x1cb   : > { %1464 = vmatmul.msk.bf16.vlgmr.msra.gmra.mxu0 %vm962_vm5, %v1514_v14  ;;  %1468 = vmatmul.msk.bf16.vlgmr.msra.gmra.mxu2 %vm962_vm5, %v1518_v15 }
 0x1cc   : > { %1472 = vmatmul.msk.bf16.vlgmr.msra.gmra.mxu1 %vm962_vm5, %v1514_v14  ;;  %1476 = vmatmul.msk.bf16.vlgmr.msra.gmra.mxu3 %vm962_vm5, %v1518_v15 }
 0x1db   : > { %1465 = vmatmul.msk.bf16.gmra.mxu0 %vm962_vm5, %v1515_v16  ;;  %1469 = vmatmul.msk.bf16.gmra.mxu2 %vm962_vm5, %v1519_v17 }
 0x1dc   : > { %1473 = vmatmul.msk.bf16.gmra.mxu1 %vm962_vm5, %v1515_v16  ;;  %1477 = vmatmul.msk.bf16.gmra.mxu3 %vm962_vm5, %v1519_v17 }
 0x1eb   : > { %1466 = vmatmul.msk.bf16.gmra.mxu0 %vm962_vm5, %v1516_v18  ;;  %1470 = vmatmul.msk.bf16.gmra.mxu2 %vm962_vm5, %v1520_v19 }
 0x1ec   : > { %1474 = vmatmul.msk.bf16.gmra.mxu1 %vm962_vm5, %v1516_v18  ;;  %1478 = vmatmul.msk.bf16.gmra.mxu3 %vm962_vm5, %v1520_v19 }
 0x1fb   : > { %1467 = vmatmul.msk.bf16.gmra.mxu0 %vm962_vm5, %v1517_v20  ;;  %1471 = vmatmul.msk.bf16.gmra.mxu2 %vm962_vm5, %v1521_v21 }
 0x1fc   : > { %1475 = vmatmul.msk.bf16.gmra.mxu1 %vm962_vm5, %v1517_v20  ;;  %1479 = vmatmul.msk.bf16.gmra.mxu3 %vm962_vm5, %v1521_v21 }
 0x248   : > { %v1003_v22 = vpop.f32.mrf.mxu0 }
 0x249   : > { %1092 = vst [vmem:[%s1729_s8] sm:$0xff] %v1003_v22  ;;  %v1052_v23 = vpop.f32.mrf.mxu1 }
 0x24a   : > { %1093 = vst [vmem:[%s1729_s8 + $0x8] sm:$0xff] %v1052_v23 }
 0x24e   : > { %v1023_v24 = vpop.f32.mrf.mxu2 }
 0x24f   : > { %1108 = vst [vmem:[%s1729_s8 + $0x80] sm:$0xff] %v1023_v24  ;;  %v1072_v25 = vpop.f32.mrf.mxu3 }
 0x250   : > { %1109 = vst [vmem:[%s1729_s8 + $0x88] sm:$0xff] %v1072_v25  ;;  %v1005_v26 = vpop.f32.mrf.mxu0 }
 0x251   : > { %1094 = vst [vmem:[%s1729_s8 + $0x10] sm:$0xff] %v1005_v26  ;;  %v1054_v27 = vpop.f32.mrf.mxu1 }
 0x252   : > { %1095 = vst [vmem:[%s1729_s8 + $0x18] sm:$0xff] %v1054_v27 }
 0x256   : > { %v1025_v28 = vpop.f32.mrf.mxu2 }
 0x257   : > { %1110 = vst [vmem:[%s1729_s8 + $0x90] sm:$0xff] %v1025_v28  ;;  %v1074_v29 = vpop.f32.mrf.mxu3 }
 0x258   : > { %1111 = vst [vmem:[%s1729_s8 + $0x98] sm:$0xff] %v1074_v29  ;;  %v1008_v30 = vpop.f32.mrf.mxu0 }
 0x259   : > { %1096 = vst [vmem:[%s1729_s8 + $0x20] sm:$0xff] %v1008_v30  ;;  %v1057_v31 = vpop.f32.mrf.mxu1 }
 0x25a   : > { %1097 = vst [vmem:[%s1729_s8 + $0x28] sm:$0xff] %v1057_v31 }
 0x25e   : > { %v1028_v32 = vpop.f32.mrf.mxu2 }
 0x25f   : > { %1112 = vst [vmem:[%s1729_s8 + $0xa0] sm:$0xff] %v1028_v32  ;;  %v1077_v33 = vpop.f32.mrf.mxu3 }
 0x260   : > { %1113 = vst [vmem:[%s1729_s8 + $0xa8] sm:$0xff] %v1077_v33  ;;  %v1010_v34 = vpop.f32.mrf.mxu0 }
 0x261   : > { %1098 = vst [vmem:[%s1729_s8 + $0x30] sm:$0xff] %v1010_v34  ;;  %v1059_v35 = vpop.f32.mrf.mxu1 }
 0x262   : > { %1099 = vst [vmem:[%s1729_s8 + $0x38] sm:$0xff] %v1059_v35 }
 0x266   : > { %v1030_v36 = vpop.f32.mrf.mxu2 }
 0x267   : > { %1114 = vst [vmem:[%s1729_s8 + $0xb0] sm:$0xff] %v1030_v36  ;;  %v1079_v37 = vpop.f32.mrf.mxu3 }
 0x268   : > { %1115 = vst [vmem:[%s1729_s8 + $0xb8] sm:$0xff] %v1079_v37  ;;  %v1013_v38 = vpop.f32.mrf.mxu0 }
 0x269   : > { %1100 = vst [vmem:[%s1729_s8 + $0x40] sm:$0xff] %v1013_v38  ;;  %v1062_v39 = vpop.f32.mrf.mxu1 }
 0x26a   : > { %1101 = vst [vmem:[%s1729_s8 + $0x48] sm:$0xff] %v1062_v39 }
 0x26e   : > { %v1033_v40 = vpop.f32.mrf.mxu2 }
 0x26f   : > { %1116 = vst [vmem:[%s1729_s8 + $0xc0] sm:$0xff] %v1033_v40  ;;  %v1082_v41 = vpop.f32.mrf.mxu3 }
 0x270   : > { %1117 = vst [vmem:[%s1729_s8 + $0xc8] sm:$0xff] %v1082_v41  ;;  %v1015_v42 = vpop.f32.mrf.mxu0 }
 0x271   : > { %1102 = vst [vmem:[%s1729_s8 + $0x50] sm:$0xff] %v1015_v42  ;;  %v1064_v43 = vpop.f32.mrf.mxu1 }
 0x272   : > { %1103 = vst [vmem:[%s1729_s8 + $0x58] sm:$0xff] %v1064_v43 }
 0x276   : > { %v1035_v44 = vpop.f32.mrf.mxu2 }
 0x277   : > { %1118 = vst [vmem:[%s1729_s8 + $0xd0] sm:$0xff] %v1035_v44  ;;  %v1084_v45 = vpop.f32.mrf.mxu3 }
 0x278   : > { %1119 = vst [vmem:[%s1729_s8 + $0xd8] sm:$0xff] %v1084_v45  ;;  %v1018_v46 = vpop.f32.mrf.mxu0 }
 0x279   : > { %1104 = vst [vmem:[%s1729_s8 + $0x60] sm:$0xff] %v1018_v46  ;;  %v1067_v47 = vpop.f32.mrf.mxu1 }
 0x27a   : > { %1105 = vst [vmem:[%s1729_s8 + $0x68] sm:$0xff] %v1067_v47 }
 0x27e   : > { %v1038_v48 = vpop.f32.mrf.mxu2 }
 0x27f   : > { %1120 = vst [vmem:[%s1729_s8 + $0xe0] sm:$0xff] %v1038_v48  ;;  %v1087_v49 = vpop.f32.mrf.mxu3 }
 0x280   : > { %1121 = vst [vmem:[%s1729_s8 + $0xe8] sm:$0xff] %v1087_v49  ;;  %v1020_v50 = vpop.f32.mrf.mxu0 }
 0x281   : > { %1106 = vst [vmem:[%s1729_s8 + $0x70] sm:$0xff] %v1020_v50  ;;  %v1069_v51 = vpop.f32.mrf.mxu1 }
 0x282   : > { %1107 = vst [vmem:[%s1729_s8 + $0x78] sm:$0xff] %v1069_v51 }
 0x286   : > { %v1040_v52 = vpop.f32.mrf.mxu2 }
 0x287   : > { %1122 = vst [vmem:[%s1729_s8 + $0xf0] sm:$0xff] %v1040_v52  ;;  %v1089_v53 = vpop.f32.mrf.mxu3 }
 0x288   : > { %1123 = vst [vmem:[%s1729_s8 + $0xf8] sm:$0xff] %v1089_v53 }
 0x289 PF: > { %s15_s22 = sadd.s32 1, %s1643_s22   ;;  %s1953_s18 = smov %s1635_s20 }
 0x28a   : > { %p12_p1 = scmp.ge.s32.totalorder %s15_s22, 6   ;;  %s1954_s19 = smov %s1639_s21 }
 0x28b   : > { %s1955_s20 = smov %s1958_s23  ;;  %s1956_s21 = smov %s1962_s24 }
 0x28c   :  { %14 = sbr.rel (!%p12_p1) target bundleno = 3 (0x3), region = 92 }

</bundles_post_ra>
